<compile_context>
chip_gen: v5e
topology: v5e:2x2
jax: 0.10.0
libtpu: 0.0.40
codegen_flags: <defaults>
</compile_context>

<pallas_src>
import functools
import math

import jax
import jax.numpy as jnp
from jax.experimental import pallas as pl
from jax.experimental.pallas import tpu as pltpu


def _align8(n):
    return ((n + 7) // 8) * 8


def _sigmoid(x):
    # divide-free: tanh goes to the EUP slot, no VPU Newton/divide sequence
    return 0.5 * jnp.tanh(0.5 * x) + 0.5


# ----------------------------------------------------------------------------
# Fused kernel: stacked bidirectional GRU + attention head
# ----------------------------------------------------------------------------
def _han_sent_kernel(x_ref, p_ref, a_ref, d_ref, gx_buf, h_buf, *,
                     layout, num_layers, seq_len, batch, hidden):
    S, B, H = seq_len, batch, hidden
    HH, H4, H6, SB = 2 * H, 4 * H, 6 * H, seq_len * batch

    # gate-column order everywhere: [r_f | r_b | z_f | z_b | n_f | n_b]
    x = x_ref[...]                                                  # [S*B, D0]
    for layer in range(num_layers):
        lo = layout["gru"][layer]
        d_in = lo["d_in"]
        w_ih = p_ref[lo["w_ih"]:lo["w_ih"] + d_in, 0:H6]            # [Din, 6H]
        b_ih = p_ref[lo["b_ih"]:lo["b_ih"] + 1, 0:H6]               # [1, 6H]
        w_hh = p_ref[lo["w_hh"]:lo["w_hh"] + HH, 0:H6]              # [2H, 6H]
        b_hh = p_ref[lo["b_hh"]:lo["b_hh"] + 1, 0:H6]               # [1, 6H]

        # ---- hoisted input projection: ONE MXU matmul for all steps/dirs ----
        gx = jnp.dot(x, w_ih, preferred_element_type=jnp.float32) + b_ih

        # ---- time-align backward-direction gate inputs (off the serial path)
        # gx_buf row-block t holds fwd gates of time t and bwd gates of S-1-t,
        # so the recurrence below reads one contiguous [B,6H] slab per step.
        gx_buf[...] = gx
        for t in range(S):
            tb = S - 1 - t
            if tb != t:
                src = gx[tb * B:(tb + 1) * B]
                gx_buf[t * B:(t + 1) * B, H:2 * H] = src[:, H:2 * H]        # r_b
                gx_buf[t * B:(t + 1) * B, 3 * H:4 * H] = src[:, 3 * H:4 * H]  # z_b
                gx_buf[t * B:(t + 1) * B, 5 * H:6 * H] = src[:, 5 * H:6 * H]  # n_b

        # ---- serial recurrence: fwd + bwd advance together, merged gates ----
        h = jnp.zeros((B, HH), jnp.float32)                         # [h_f|h_b]
        for t in range(S):                      # S is small & static: unroll
            g = gx_buf[t * B:(t + 1) * B, :]                        # [B, 6H]
            gh = jnp.dot(h, w_hh, preferred_element_type=jnp.float32) + b_hh
            rz = _sigmoid(g[:, :H4] + gh[:, :H4])     # [B,4H] = [r_f|r_b|z_f|z_b]
            r = rz[:, :HH]                                          # [r_f|r_b]
            z = rz[:, HH:]                                          # [z_f|z_b]
            n = jnp.tanh(g[:, H4:] + r * gh[:, H4:])                # [n_f|n_b]
            h = n + z * (h - n)                   # == (1-z)*n + z*h, per dir
            h_buf[t * B:(t + 1) * B, 0:H] = h[:, 0:H]               # fwd @ t
            h_buf[(S - 1 - t) * B:(S - t) * B, H:HH] = h[:, H:HH]   # bwd @ S-1-t
        x = h_buf[...]                     # layer output, torch layout [SB,2H]

    # ---- attention head: u = tanh(h w + b); a = softmax(u c); d = h^T a ----
    ao = layout["attn"]
    w_a = p_ref[ao["w"]:ao["w"] + HH, 0:HH]                         # [2H, 2H]
    b_a = p_ref[ao["b"]:ao["b"] + 1, 0:HH]                          # [1, 2H]
    c_a = p_ref[ao["c"]:ao["c"] + HH, 0:1]                          # [2H, 1]
    sel = p_ref[ao["sel"]:ao["sel"] + B, 0:SB]     # [B, S*B] 0/1 batch gather
    ohs = p_ref[ao["ohs"]:ao["ohs"] + SB, 0:S]     # [S*B, S] 0/1 time scatter

    h = x                                                           # [SB, 2H]
    u = jnp.tanh(jnp.dot(h, w_a, preferred_element_type=jnp.float32) + b_a)
    sc = jnp.dot(u, c_a, preferred_element_type=jnp.float32)        # [SB, 1]
    m = jnp.max(sc, axis=0, keepdims=True)        # global max: softmax-invariant
    e = jnp.exp(sc - m)                                             # [SB, 1]
    ew = jnp.dot(sel, e * ohs, preferred_element_type=jnp.float32)  # [B, S]
    inv = pl.reciprocal(jnp.sum(ew, axis=1, keepdims=True), approx=True)
    a_ref[...] = ew * inv                                           # [B, S]
    d_ref[...] = jnp.dot(sel, e * h, preferred_element_type=jnp.float32) * inv


# ----------------------------------------------------------------------------
# Wrapper
# ----------------------------------------------------------------------------
def sent_attn_forward(doc, params):
    """doc: [B, S, 2*word_hidden_dim] -> (a: [B, S], d: [B, 2*sent_hidden_dim])."""
    slab, layout, dims = params["slab"], params["layout"], params["dims"]
    B, S, D0 = doc.shape
    assert (B, S, D0) == (dims["B"], dims["S"], dims["d0"]), (B, S, D0)
    H = dims["H"]
    num_layers = dims["num_layers"]
    HH = 2 * H

    # time-major flatten (row = s*B + b): per-timestep blocks become contiguous
    # sublane slices inside the kernel (cheap XLA op on tiny input).
    x_flat = jnp.transpose(doc, (1, 0, 2)).reshape(S * B, D0)

    kernel = functools.partial(_han_sent_kernel, layout=layout,
                               num_layers=num_layers, seq_len=S, batch=B,
                               hidden=H)
    vmem = pl.BlockSpec(memory_space=pltpu.MemorySpace.VMEM)
    a, d = pl.pallas_call(
        kernel,
        out_shape=(jax.ShapeDtypeStruct((B, S), jnp.float32),
                   jax.ShapeDtypeStruct((B, HH), jnp.float32)),
        in_specs=[vmem, vmem],
        out_specs=(vmem, vmem),
        scratch_shapes=[pltpu.VMEM((S * B, 6 * H), jnp.float32),   # gx_buf
                        pltpu.VMEM((S * B, 2 * H), jnp.float32)],  # h_buf
    )(x_flat, slab)
    return a, d


# ----------------------------------------------------------------------------
# Host-side parameter preparation (fusion + single-slab packing)
# ----------------------------------------------------------------------------
def _fuse_bidir_layer(fwd, bwd, H):
    """Fuse per-direction (w_ih[3,Din,H], w_hh[3,H,H], b_ih[3,1,H], b_hh[3,1,H])
    (gate order r, z, n) into the kernel layout with gate-column order
    [r_f|r_b|z_f|z_b|n_f|n_b]:
      W_ih [Din, 6H], merged r/z biases [1, 6H],
      block-diagonal W_hh [2H, 6H], n-gate hidden bias [1, 6H].
    NOTE: torch stores weight_ih_l{k} as [3H, Din]; loading a real checkpoint
    requires transposing/splitting into this [3, Din, H] layout first."""
    wif, whf, bif, bhf = fwd
    wib, whb, bib, bhb = bwd
    Z = jnp.zeros((H, H), jnp.float32)
    w_ih = jnp.concatenate(
        [wif[0], wib[0], wif[1], wib[1], wif[2], wib[2]], axis=1)   # [Din, 6H]
    b_ih = jnp.concatenate(
        [bif[0] + bhf[0], bib[0] + bhb[0],
         bif[1] + bhf[1], bib[1] + bhb[1],
         bif[2], bib[2]], axis=1)                                   # [1, 6H]
    w_hh = jnp.concatenate(
        [jnp.concatenate([whf[0], Z, whf[1], Z, whf[2], Z], axis=1),
         jnp.concatenate([Z, whb[0], Z, whb[1], Z, whb[2]], axis=1)],
        axis=0)                                                     # [2H, 6H]
    zb = jnp.zeros_like(bhf[0])
    b_hh = jnp.concatenate([zb, zb, zb, zb, bhf[2], bhb[2]], axis=1)  # [1, 6H]
    return (w_ih, b_ih, w_hh, b_hh)


def _pack_slab(named_blocks):
    """Pack a list of (name, 2D f32 array) into one slab; every block starts at
    an 8-aligned row offset (sublane-aligned static slices inside the kernel)."""
    width = max(int(a.shape[1]) for _, a in named_blocks)
    pieces, offsets, off = [], {}, 0
    for name, arr in named_blocks:
        r, c = int(arr.shape[0]), int(arr.shape[1])
        rp = _align8(r)
        block = jnp.zeros((rp, width), jnp.float32)
        block = block.at[:r, :c].set(arr.astype(jnp.float32))
        pieces.append(block)
        offsets[name] = off
        off += rp
    return jnp.concatenate(pieces, axis=0), offsets


def init_params(key, word_hidden_dim, sent_hidden_dim, sent_num_layers,
                batch, seq_len):
    """Random parameters with the same shapes/init style as the PyTorch module,
    pre-fused and packed into one f32 slab + static row-offset layout."""
    H = sent_hidden_dim
    HH = 2 * H
    B, S = batch, seq_len
    k = 1.0 / math.sqrt(H)                      # torch.nn.GRU default init bound
    keys = iter(jax.random.split(key, 8 * sent_num_layers + 4))

    named, gru_layout = [], []
    d_in = 2 * word_hidden_dim
    for layer in range(sent_num_layers):
        per_dir = []
        for _direction in range(2):             # forward, backward
            w_ih = jax.random.uniform(next(keys), (3, d_in, H), jnp.float32, -k, k)
            w_hh = jax.random.uniform(next(keys), (3, H, H), jnp.float32, -k, k)
            b_ih = jax.random.uniform(next(keys), (3, 1, H), jnp.float32, -k, k)
            b_hh = jax.random.uniform(next(keys), (3, 1, H), jnp.float32, -k, k)
            per_dir.append((w_ih, w_hh, b_ih, b_hh))
        fw_ih, fb_ih, fw_hh, fb_hh = _fuse_bidir_layer(per_dir[0], per_dir[1], H)
        named += [(f"l{layer}_w_ih", fw_ih), (f"l{layer}_b_ih", fb_ih),
                  (f"l{layer}_w_hh", fw_hh), (f"l{layer}_b_hh", fb_hh)]
        gru_layout.append({"d_in": d_in})
        d_in = HH

    bound_w = math.sqrt(2.0) * math.sqrt(3.0 / HH)   # kaiming_uniform, fan_in, relu
    w = jax.random.uniform(next(keys), (HH, HH), jnp.float32, -bound_w, bound_w)
    b_row = jnp.zeros((1, HH), jnp.float32)
    bound_c = math.sqrt(2.0) * math.sqrt(3.0 / 1.0)  # c_s: [2H, 1] -> fan_in = 1
    c_col = jax.random.uniform(next(keys), (HH, 1), jnp.float32, -bound_c, bound_c)

    # 0/1 constants for the lane-dense softmax / weighted-sum matmuls:
    #   sel[b, s*B+b'] = (b' == b)      ohs[s*B+b, s'] = (s' == s)
    sel = jnp.tile(jnp.eye(B, dtype=jnp.float32), (1, S))            # [B, S*B]
    ohs = jnp.repeat(jnp.eye(S, dtype=jnp.float32), B, axis=0)       # [S*B, S]

    named += [("attn_w", w), ("attn_b", b_row), ("attn_c", c_col),
              ("attn_sel", sel), ("attn_ohs", ohs)]

    slab, offs = _pack_slab(named)
    for layer in range(sent_num_layers):
        gru_layout[layer].update(
            w_ih=offs[f"l{layer}_w_ih"], b_ih=offs[f"l{layer}_b_ih"],
            w_hh=offs[f"l{layer}_w_hh"], b_hh=offs[f"l{layer}_b_hh"])
    layout = {"gru": tuple(gru_layout),
              "attn": {"w": offs["attn_w"], "b": offs["attn_b"],
                       "c": offs["attn_c"], "sel": offs["attn_sel"],
                       "ohs": offs["attn_ohs"]}}
    dims = {"H": H, "num_layers": sent_num_layers, "B": B, "S": S,
            "d0": 2 * word_hidden_dim}
    return {"slab": slab, "layout": layout, "dims": dims}


if __name__ == "__main__":
    word_hidden_dim = 16
    sent_hidden_dim = 16
    sent_num_layers = 2
    B, S = 2, 8

    key = jax.random.PRNGKey(0)
    pkey, dkey = jax.random.split(key)
    params = init_params(pkey, word_hidden_dim, sent_hidden_dim,
                         sent_num_layers, B, S)
    doc = jax.random.normal(dkey, (B, S, 2 * word_hidden_dim), jnp.float32)

    fwd = jax.jit(functools.partial(sent_attn_forward, params=params))
    a, d = fwd(doc)
    jax.block_until_ready((a, d))

    assert a.shape == (B, S), a.shape
    assert d.shape == (B, 2 * sent_hidden_dim), d.shape
    assert bool(jnp.all(jnp.isfinite(a))) and bool(jnp.all(jnp.isfinite(d)))
    # attention weights: softmax over num_sents must sum to ~1 per batch element
    # (slightly loosened tolerance because of the approx EUP reciprocal).
    assert bool(jnp.allclose(jnp.sum(a, axis=1), 1.0, atol=2e-3))
    print("KERNEL_OK")
</pallas_src>

<mosaic_0001>
module attributes {stable_mosaic.version = 11 : i64} {
  func.func @_han_sent_kernel(%arg0: memref<16x32xf32, #tpu.memory_space<vmem>>, %arg1: memref<256x96xf32, #tpu.memory_space<vmem>>, %arg2: memref<2x8xf32, #tpu.memory_space<vmem>>, %arg3: memref<2x32xf32, #tpu.memory_space<vmem>>, %arg4: memref<16x96xf32, #tpu.memory_space<vmem>>, %arg5: memref<16x32xf32, #tpu.memory_space<vmem>>) attributes {dimension_semantics = [], scalar_prefetch = 0 : i64, scratch_operands = 2 : i64, tpu.core_type = #tpu.core_type<tc>} {
    %c0 = arith.constant 0 : index
    %c0_0 = arith.constant 0 : index
    %0 = vector.load %arg0[%c0, %c0_0] : memref<16x32xf32, #tpu.memory_space<vmem>>, vector<16x32xf32>
    %c0_1 = arith.constant 0 : index
    %c0_2 = arith.constant 0 : index
    %1 = vector.load %arg1[%c0_1, %c0_2] : memref<256x96xf32, #tpu.memory_space<vmem>>, vector<32x96xf32>
    %c32 = arith.constant 32 : index
    %c0_3 = arith.constant 0 : index
    %2 = vector.load %arg1[%c32, %c0_3] : memref<256x96xf32, #tpu.memory_space<vmem>>, vector<1x96xf32>
    %c40 = arith.constant 40 : index
    %c0_4 = arith.constant 0 : index
    %3 = vector.load %arg1[%c40, %c0_4] : memref<256x96xf32, #tpu.memory_space<vmem>>, vector<32x96xf32>
    %c72 = arith.constant 72 : index
    %c0_5 = arith.constant 0 : index
    %4 = vector.load %arg1[%c72, %c0_5] : memref<256x96xf32, #tpu.memory_space<vmem>>, vector<1x96xf32>
    %cst = arith.constant dense<0.000000e+00> : vector<16x96xf32>
    %5 = tpu.matmul %0, %1, %cst {dimension_numbers = #tpu.dot_dimension_numbers<[1], [0], [0], [1], [0, 0, 1, 1], [], []>} : vector<16x32xf32>, vector<32x96xf32>, vector<16x96xf32> -> vector<16x96xf32>
    %6 = vector.broadcast %2 : vector<1x96xf32> to vector<16x96xf32>
    %7 = arith.addf %5, %6 : vector<16x96xf32>
    %c0_6 = arith.constant 0 : index
    %c0_7 = arith.constant 0 : index
    %8 = vector.load %arg4[%c0_6, %c0_7] : memref<16x96xf32, #tpu.memory_space<vmem>>, vector<16x96xf32>
    tpu.vector_store %arg4[%c0_6, %c0_7], %7 {strides = array<i32>} : memref<16x96xf32, #tpu.memory_space<vmem>>, vector<16x96xf32>,
    %9 = vector.extract_strided_slice %7 {offsets = [14, 0], sizes = [2, 96], strides = [1, 1]} : vector<16x96xf32> to vector<2x96xf32>
    %10 = vector.extract_strided_slice %9 {offsets = [0, 16], sizes = [2, 16], strides = [1, 1]} : vector<2x96xf32> to vector<2x16xf32>
    %c0_8 = arith.constant 0 : index
    %c16 = arith.constant 16 : index
    %11 = vector.load %arg4[%c0_8, %c16] : memref<16x96xf32, #tpu.memory_space<vmem>>, vector<2x16xf32>
    tpu.vector_store %arg4[%c0_8, %c16], %10 {strides = array<i32>} : memref<16x96xf32, #tpu.memory_space<vmem>>, vector<2x16xf32>,
    %12 = vector.extract_strided_slice %9 {offsets = [0, 48], sizes = [2, 16], strides = [1, 1]} : vector<2x96xf32> to vector<2x16xf32>
    %c0_9 = arith.constant 0 : index
    %c48 = arith.constant 48 : index
    %13 = vector.load %arg4[%c0_9, %c48] : memref<16x96xf32, #tpu.memory_space<vmem>>, vector<2x16xf32>
    tpu.vector_store %arg4[%c0_9, %c48], %12 {strides = array<i32>} : memref<16x96xf32, #tpu.memory_space<vmem>>, vector<2x16xf32>,
    %14 = vector.extract_strided_slice %9 {offsets = [0, 80], sizes = [2, 16], strides = [1, 1]} : vector<2x96xf32> to vector<2x16xf32>
    %c0_10 = arith.constant 0 : index
    %c80 = arith.constant 80 : index
    %15 = vector.load %arg4[%c0_10, %c80] : memref<16x96xf32, #tpu.memory_space<vmem>>, vector<2x16xf32>
    tpu.vector_store %arg4[%c0_10, %c80], %14 {strides = array<i32>} : memref<16x96xf32, #tpu.memory_space<vmem>>, vector<2x16xf32>,
    %16 = vector.extract_strided_slice %7 {offsets = [12, 0], sizes = [2, 96], strides = [1, 1]} : vector<16x96xf32> to vector<2x96xf32>
    %17 = vector.extract_strided_slice %16 {offsets = [0, 16], sizes = [2, 16], strides = [1, 1]} : vector<2x96xf32> to vector<2x16xf32>
    %c2 = arith.constant 2 : index
    %c16_11 = arith.constant 16 : index
    %18 = vector.load %arg4[%c2, %c16_11] : memref<16x96xf32, #tpu.memory_space<vmem>>, vector<2x16xf32>
    tpu.vector_store %arg4[%c2, %c16_11], %17 {strides = array<i32>} : memref<16x96xf32, #tpu.memory_space<vmem>>, vector<2x16xf32>,
    %19 = vector.extract_strided_slice %16 {offsets = [0, 48], sizes = [2, 16], strides = [1, 1]} : vector<2x96xf32> to vector<2x16xf32>
    %c2_12 = arith.constant 2 : index
    %c48_13 = arith.constant 48 : index
    %20 = vector.load %arg4[%c2_12, %c48_13] : memref<16x96xf32, #tpu.memory_space<vmem>>, vector<2x16xf32>
    tpu.vector_store %arg4[%c2_12, %c48_13], %19 {strides = array<i32>} : memref<16x96xf32, #tpu.memory_space<vmem>>, vector<2x16xf32>,
    %21 = vector.extract_strided_slice %16 {offsets = [0, 80], sizes = [2, 16], strides = [1, 1]} : vector<2x96xf32> to vector<2x16xf32>
    %c2_14 = arith.constant 2 : index
    %c80_15 = arith.constant 80 : index
    %22 = vector.load %arg4[%c2_14, %c80_15] : memref<16x96xf32, #tpu.memory_space<vmem>>, vector<2x16xf32>
    tpu.vector_store %arg4[%c2_14, %c80_15], %21 {strides = array<i32>} : memref<16x96xf32, #tpu.memory_space<vmem>>, vector<2x16xf32>,
    %23 = vector.extract_strided_slice %7 {offsets = [10, 0], sizes = [2, 96], strides = [1, 1]} : vector<16x96xf32> to vector<2x96xf32>
    %24 = vector.extract_strided_slice %23 {offsets = [0, 16], sizes = [2, 16], strides = [1, 1]} : vector<2x96xf32> to vector<2x16xf32>
    %c4 = arith.constant 4 : index
    %c16_16 = arith.constant 16 : index
    %25 = vector.load %arg4[%c4, %c16_16] : memref<16x96xf32, #tpu.memory_space<vmem>>, vector<2x16xf32>
    tpu.vector_store %arg4[%c4, %c16_16], %24 {strides = array<i32>} : memref<16x96xf32, #tpu.memory_space<vmem>>, vector<2x16xf32>,
    %26 = vector.extract_strided_slice %23 {offsets = [0, 48], sizes = [2, 16], strides = [1, 1]} : vector<2x96xf32> to vector<2x16xf32>
    %c4_17 = arith.constant 4 : index
    %c48_18 = arith.constant 48 : index
    %27 = vector.load %arg4[%c4_17, %c48_18] : memref<16x96xf32, #tpu.memory_space<vmem>>, vector<2x16xf32>
    tpu.vector_store %arg4[%c4_17, %c48_18], %26 {strides = array<i32>} : memref<16x96xf32, #tpu.memory_space<vmem>>, vector<2x16xf32>,
    %28 = vector.extract_strided_slice %23 {offsets = [0, 80], sizes = [2, 16], strides = [1, 1]} : vector<2x96xf32> to vector<2x16xf32>
    %c4_19 = arith.constant 4 : index
    %c80_20 = arith.constant 80 : index
    %29 = vector.load %arg4[%c4_19, %c80_20] : memref<16x96xf32, #tpu.memory_space<vmem>>, vector<2x16xf32>
    tpu.vector_store %arg4[%c4_19, %c80_20], %28 {strides = array<i32>} : memref<16x96xf32, #tpu.memory_space<vmem>>, vector<2x16xf32>,
    %30 = vector.extract_strided_slice %7 {offsets = [8, 0], sizes = [2, 96], strides = [1, 1]} : vector<16x96xf32> to vector<2x96xf32>
    %31 = vector.extract_strided_slice %30 {offsets = [0, 16], sizes = [2, 16], strides = [1, 1]} : vector<2x96xf32> to vector<2x16xf32>
    %c6 = arith.constant 6 : index
    %c16_21 = arith.constant 16 : index
    %32 = vector.load %arg4[%c6, %c16_21] : memref<16x96xf32, #tpu.memory_space<vmem>>, vector<2x16xf32>
    tpu.vector_store %arg4[%c6, %c16_21], %31 {strides = array<i32>} : memref<16x96xf32, #tpu.memory_space<vmem>>, vector<2x16xf32>,
    %33 = vector.extract_strided_slice %30 {offsets = [0, 48], sizes = [2, 16], strides = [1, 1]} : vector<2x96xf32> to vector<2x16xf32>
    %c6_22 = arith.constant 6 : index
    %c48_23 = arith.constant 48 : index
    %34 = vector.load %arg4[%c6_22, %c48_23] : memref<16x96xf32, #tpu.memory_space<vmem>>, vector<2x16xf32>
    tpu.vector_store %arg4[%c6_22, %c48_23], %33 {strides = array<i32>} : memref<16x96xf32, #tpu.memory_space<vmem>>, vector<2x16xf32>,
    %35 = vector.extract_strided_slice %30 {offsets = [0, 80], sizes = [2, 16], strides = [1, 1]} : vector<2x96xf32> to vector<2x16xf32>
    %c6_24 = arith.constant 6 : index
    %c80_25 = arith.constant 80 : index
    %36 = vector.load %arg4[%c6_24, %c80_25] : memref<16x96xf32, #tpu.memory_space<vmem>>, vector<2x16xf32>
    tpu.vector_store %arg4[%c6_24, %c80_25], %35 {strides = array<i32>} : memref<16x96xf32, #tpu.memory_space<vmem>>, vector<2x16xf32>,
    %37 = vector.extract_strided_slice %7 {offsets = [6, 0], sizes = [2, 96], strides = [1, 1]} : vector<16x96xf32> to vector<2x96xf32>
    %38 = vector.extract_strided_slice %37 {offsets = [0, 16], sizes = [2, 16], strides = [1, 1]} : vector<2x96xf32> to vector<2x16xf32>
    %c8 = arith.constant 8 : index
    %c16_26 = arith.constant 16 : index
    %39 = vector.load %arg4[%c8, %c16_26] : memref<16x96xf32, #tpu.memory_space<vmem>>, vector<2x16xf32>
    tpu.vector_store %arg4[%c8, %c16_26], %38 {strides = array<i32>} : memref<16x96xf32, #tpu.memory_space<vmem>>, vector<2x16xf32>,
    %40 = vector.extract_strided_slice %37 {offsets = [0, 48], sizes = [2, 16], strides = [1, 1]} : vector<2x96xf32> to vector<2x16xf32>
    %c8_27 = arith.constant 8 : index
    %c48_28 = arith.constant 48 : index
    %41 = vector.load %arg4[%c8_27, %c48_28] : memref<16x96xf32, #tpu.memory_space<vmem>>, vector<2x16xf32>
    tpu.vector_store %arg4[%c8_27, %c48_28], %40 {strides = array<i32>} : memref<16x96xf32, #tpu.memory_space<vmem>>, vector<2x16xf32>,
    %42 = vector.extract_strided_slice %37 {offsets = [0, 80], sizes = [2, 16], strides = [1, 1]} : vector<2x96xf32> to vector<2x16xf32>
    %c8_29 = arith.constant 8 : index
    %c80_30 = arith.constant 80 : index
    %43 = vector.load %arg4[%c8_29, %c80_30] : memref<16x96xf32, #tpu.memory_space<vmem>>, vector<2x16xf32>
    tpu.vector_store %arg4[%c8_29, %c80_30], %42 {strides = array<i32>} : memref<16x96xf32, #tpu.memory_space<vmem>>, vector<2x16xf32>,
    %44 = vector.extract_strided_slice %7 {offsets = [4, 0], sizes = [2, 96], strides = [1, 1]} : vector<16x96xf32> to vector<2x96xf32>
    %45 = vector.extract_strided_slice %44 {offsets = [0, 16], sizes = [2, 16], strides = [1, 1]} : vector<2x96xf32> to vector<2x16xf32>
    %c10 = arith.constant 10 : index
    %c16_31 = arith.constant 16 : index
    %46 = vector.load %arg4[%c10, %c16_31] : memref<16x96xf32, #tpu.memory_space<vmem>>, vector<2x16xf32>
    tpu.vector_store %arg4[%c10, %c16_31], %45 {strides = array<i32>} : memref<16x96xf32, #tpu.memory_space<vmem>>, vector<2x16xf32>,
    %47 = vector.extract_strided_slice %44 {offsets = [0, 48], sizes = [2, 16], strides = [1, 1]} : vector<2x96xf32> to vector<2x16xf32>
    %c10_32 = arith.constant 10 : index
    %c48_33 = arith.constant 48 : index
    %48 = vector.load %arg4[%c10_32, %c48_33] : memref<16x96xf32, #tpu.memory_space<vmem>>, vector<2x16xf32>
    tpu.vector_store %arg4[%c10_32, %c48_33], %47 {strides = array<i32>} : memref<16x96xf32, #tpu.memory_space<vmem>>, vector<2x16xf32>,
    %49 = vector.extract_strided_slice %44 {offsets = [0, 80], sizes = [2, 16], strides = [1, 1]} : vector<2x96xf32> to vector<2x16xf32>
    %c10_34 = arith.constant 10 : index
    %c80_35 = arith.constant 80 : index
    %50 = vector.load %arg4[%c10_34, %c80_35] : memref<16x96xf32, #tpu.memory_space<vmem>>, vector<2x16xf32>
    tpu.vector_store %arg4[%c10_34, %c80_35], %49 {strides = array<i32>} : memref<16x96xf32, #tpu.memory_space<vmem>>, vector<2x16xf32>,
    %51 = vector.extract_strided_slice %7 {offsets = [2, 0], sizes = [2, 96], strides = [1, 1]} : vector<16x96xf32> to vector<2x96xf32>
    %52 = vector.extract_strided_slice %51 {offsets = [0, 16], sizes = [2, 16], strides = [1, 1]} : vector<2x96xf32> to vector<2x16xf32>
    %c12 = arith.constant 12 : index
    %c16_36 = arith.constant 16 : index
    %53 = vector.load %arg4[%c12, %c16_36] : memref<16x96xf32, #tpu.memory_space<vmem>>, vector<2x16xf32>
    tpu.vector_store %arg4[%c12, %c16_36], %52 {strides = array<i32>} : memref<16x96xf32, #tpu.memory_space<vmem>>, vector<2x16xf32>,
    %54 = vector.extract_strided_slice %51 {offsets = [0, 48], sizes = [2, 16], strides = [1, 1]} : vector<2x96xf32> to vector<2x16xf32>
    %c12_37 = arith.constant 12 : index
    %c48_38 = arith.constant 48 : index
    %55 = vector.load %arg4[%c12_37, %c48_38] : memref<16x96xf32, #tpu.memory_space<vmem>>, vector<2x16xf32>
    tpu.vector_store %arg4[%c12_37, %c48_38], %54 {strides = array<i32>} : memref<16x96xf32, #tpu.memory_space<vmem>>, vector<2x16xf32>,
    %56 = vector.extract_strided_slice %51 {offsets = [0, 80], sizes = [2, 16], strides = [1, 1]} : vector<2x96xf32> to vector<2x16xf32>
    %c12_39 = arith.constant 12 : index
    %c80_40 = arith.constant 80 : index
    %57 = vector.load %arg4[%c12_39, %c80_40] : memref<16x96xf32, #tpu.memory_space<vmem>>, vector<2x16xf32>
    tpu.vector_store %arg4[%c12_39, %c80_40], %56 {strides = array<i32>} : memref<16x96xf32, #tpu.memory_space<vmem>>, vector<2x16xf32>,
    %58 = vector.extract_strided_slice %7 {offsets = [0, 0], sizes = [2, 96], strides = [1, 1]} : vector<16x96xf32> to vector<2x96xf32>
    %59 = vector.extract_strided_slice %58 {offsets = [0, 16], sizes = [2, 16], strides = [1, 1]} : vector<2x96xf32> to vector<2x16xf32>
    %c14 = arith.constant 14 : index
    %c16_41 = arith.constant 16 : index
    %60 = vector.load %arg4[%c14, %c16_41] : memref<16x96xf32, #tpu.memory_space<vmem>>, vector<2x16xf32>
    tpu.vector_store %arg4[%c14, %c16_41], %59 {strides = array<i32>} : memref<16x96xf32, #tpu.memory_space<vmem>>, vector<2x16xf32>,
    %61 = vector.extract_strided_slice %58 {offsets = [0, 48], sizes = [2, 16], strides = [1, 1]} : vector<2x96xf32> to vector<2x16xf32>
    %c14_42 = arith.constant 14 : index
    %c48_43 = arith.constant 48 : index
    %62 = vector.load %arg4[%c14_42, %c48_43] : memref<16x96xf32, #tpu.memory_space<vmem>>, vector<2x16xf32>
    tpu.vector_store %arg4[%c14_42, %c48_43], %61 {strides = array<i32>} : memref<16x96xf32, #tpu.memory_space<vmem>>, vector<2x16xf32>,
    %63 = vector.extract_strided_slice %58 {offsets = [0, 80], sizes = [2, 16], strides = [1, 1]} : vector<2x96xf32> to vector<2x16xf32>
    %c14_44 = arith.constant 14 : index
    %c80_45 = arith.constant 80 : index
    %64 = vector.load %arg4[%c14_44, %c80_45] : memref<16x96xf32, #tpu.memory_space<vmem>>, vector<2x16xf32>
    tpu.vector_store %arg4[%c14_44, %c80_45], %63 {strides = array<i32>} : memref<16x96xf32, #tpu.memory_space<vmem>>, vector<2x16xf32>,
    %cst_46 = arith.constant 0.000000e+00 : f32
    %65 = vector.broadcast %cst_46 : f32 to vector<2x32xf32>
    %c0_47 = arith.constant 0 : index
    %c0_48 = arith.constant 0 : index
    %66 = vector.load %arg4[%c0_47, %c0_48] : memref<16x96xf32, #tpu.memory_space<vmem>>, vector<2x96xf32>
    %cst_49 = arith.constant dense<0.000000e+00> : vector<2x96xf32>
    %67 = tpu.matmul %65, %3, %cst_49 {dimension_numbers = #tpu.dot_dimension_numbers<[1], [0], [0], [1], [0, 0, 1, 1], [], []>} : vector<2x32xf32>, vector<32x96xf32>, vector<2x96xf32> -> vector<2x96xf32>
    %68 = vector.broadcast %4 : vector<1x96xf32> to vector<2x96xf32>
    %69 = arith.addf %67, %68 : vector<2x96xf32>
    %70 = vector.extract_strided_slice %66 {offsets = [0, 0], sizes = [2, 64], strides = [1, 1]} : vector<2x96xf32> to vector<2x64xf32>
    %71 = vector.extract_strided_slice %69 {offsets = [0, 0], sizes = [2, 64], strides = [1, 1]} : vector<2x96xf32> to vector<2x64xf32>
    %72 = arith.addf %70, %71 : vector<2x64xf32>
    %cst_50 = arith.constant 5.000000e-01 : f32
    %73 = vector.broadcast %cst_50 : f32 to vector<2x64xf32>
    %74 = arith.mulf %73, %72 : vector<2x64xf32>
    %75 = math.tanh %74 : vector<2x64xf32>
    %cst_51 = arith.constant 5.000000e-01 : f32
    %76 = vector.broadcast %cst_51 : f32 to vector<2x64xf32>
    %77 = arith.mulf %76, %75 : vector<2x64xf32>
    %cst_52 = arith.constant 5.000000e-01 : f32
    %78 = vector.broadcast %cst_52 : f32 to vector<2x64xf32>
    %79 = arith.addf %77, %78 : vector<2x64xf32>
    %80 = vector.extract_strided_slice %79 {offsets = [0, 0], sizes = [2, 32], strides = [1, 1]} : vector<2x64xf32> to vector<2x32xf32>
    %81 = vector.extract_strided_slice %79 {offsets = [0, 32], sizes = [2, 32], strides = [1, 1]} : vector<2x64xf32> to vector<2x32xf32>
    %82 = vector.extract_strided_slice %66 {offsets = [0, 64], sizes = [2, 32], strides = [1, 1]} : vector<2x96xf32> to vector<2x32xf32>
    %83 = vector.extract_strided_slice %69 {offsets = [0, 64], sizes = [2, 32], strides = [1, 1]} : vector<2x96xf32> to vector<2x32xf32>
    %84 = arith.mulf %80, %83 : vector<2x32xf32>
    %85 = arith.addf %82, %84 : vector<2x32xf32>
    %86 = math.tanh %85 : vector<2x32xf32>
    %87 = arith.subf %65, %86 : vector<2x32xf32>
    %88 = arith.mulf %81, %87 : vector<2x32xf32>
    %89 = arith.addf %86, %88 : vector<2x32xf32>
    %90 = vector.extract_strided_slice %89 {offsets = [0, 0], sizes = [2, 16], strides = [1, 1]} : vector<2x32xf32> to vector<2x16xf32>
    %c0_53 = arith.constant 0 : index
    %c0_54 = arith.constant 0 : index
    %91 = vector.load %arg5[%c0_53, %c0_54] : memref<16x32xf32, #tpu.memory_space<vmem>>, vector<2x16xf32>
    tpu.vector_store %arg5[%c0_53, %c0_54], %90 {strides = array<i32>} : memref<16x32xf32, #tpu.memory_space<vmem>>, vector<2x16xf32>,
    %92 = vector.extract_strided_slice %89 {offsets = [0, 16], sizes = [2, 16], strides = [1, 1]} : vector<2x32xf32> to vector<2x16xf32>
    %c14_55 = arith.constant 14 : index
    %c16_56 = arith.constant 16 : index
    %93 = vector.load %arg5[%c14_55, %c16_56] : memref<16x32xf32, #tpu.memory_space<vmem>>, vector<2x16xf32>
    tpu.vector_store %arg5[%c14_55, %c16_56], %92 {strides = array<i32>} : memref<16x32xf32, #tpu.memory_space<vmem>>, vector<2x16xf32>,
    %c2_57 = arith.constant 2 : index
    %c0_58 = arith.constant 0 : index
    %94 = vector.load %arg4[%c2_57, %c0_58] : memref<16x96xf32, #tpu.memory_space<vmem>>, vector<2x96xf32>
    %cst_59 = arith.constant dense<0.000000e+00> : vector<2x96xf32>
    %95 = tpu.matmul %89, %3, %cst_59 {dimension_numbers = #tpu.dot_dimension_numbers<[1], [0], [0], [1], [0, 0, 1, 1], [], []>} : vector<2x32xf32>, vector<32x96xf32>, vector<2x96xf32> -> vector<2x96xf32>
    %96 = vector.broadcast %4 : vector<1x96xf32> to vector<2x96xf32>
    %97 = arith.addf %95, %96 : vector<2x96xf32>
    %98 = vector.extract_strided_slice %94 {offsets = [0, 0], sizes = [2, 64], strides = [1, 1]} : vector<2x96xf32> to vector<2x64xf32>
    %99 = vector.extract_strided_slice %97 {offsets = [0, 0], sizes = [2, 64], strides = [1, 1]} : vector<2x96xf32> to vector<2x64xf32>
    %100 = arith.addf %98, %99 : vector<2x64xf32>
    %cst_60 = arith.constant 5.000000e-01 : f32
    %101 = vector.broadcast %cst_60 : f32 to vector<2x64xf32>
    %102 = arith.mulf %101, %100 : vector<2x64xf32>
    %103 = math.tanh %102 : vector<2x64xf32>
    %cst_61 = arith.constant 5.000000e-01 : f32
    %104 = vector.broadcast %cst_61 : f32 to vector<2x64xf32>
    %105 = arith.mulf %104, %103 : vector<2x64xf32>
    %cst_62 = arith.constant 5.000000e-01 : f32
    %106 = vector.broadcast %cst_62 : f32 to vector<2x64xf32>
    %107 = arith.addf %105, %106 : vector<2x64xf32>
    %108 = vector.extract_strided_slice %107 {offsets = [0, 0], sizes = [2, 32], strides = [1, 1]} : vector<2x64xf32> to vector<2x32xf32>
    %109 = vector.extract_strided_slice %107 {offsets = [0, 32], sizes = [2, 32], strides = [1, 1]} : vector<2x64xf32> to vector<2x32xf32>
    %110 = vector.extract_strided_slice %94 {offsets = [0, 64], sizes = [2, 32], strides = [1, 1]} : vector<2x96xf32> to vector<2x32xf32>
    %111 = vector.extract_strided_slice %97 {offsets = [0, 64], sizes = [2, 32], strides = [1, 1]} : vector<2x96xf32> to vector<2x32xf32>
    %112 = arith.mulf %108, %111 : vector<2x32xf32>
    %113 = arith.addf %110, %112 : vector<2x32xf32>
    %114 = math.tanh %113 : vector<2x32xf32>
    %115 = arith.subf %89, %114 : vector<2x32xf32>
    %116 = arith.mulf %109, %115 : vector<2x32xf32>
    %117 = arith.addf %114, %116 : vector<2x32xf32>
    %118 = vector.extract_strided_slice %117 {offsets = [0, 0], sizes = [2, 16], strides = [1, 1]} : vector<2x32xf32> to vector<2x16xf32>
    %c2_63 = arith.constant 2 : index
    %c0_64 = arith.constant 0 : index
    %119 = vector.load %arg5[%c2_63, %c0_64] : memref<16x32xf32, #tpu.memory_space<vmem>>, vector<2x16xf32>
    tpu.vector_store %arg5[%c2_63, %c0_64], %118 {strides = array<i32>} : memref<16x32xf32, #tpu.memory_space<vmem>>, vector<2x16xf32>,
    %120 = vector.extract_strided_slice %117 {offsets = [0, 16], sizes = [2, 16], strides = [1, 1]} : vector<2x32xf32> to vector<2x16xf32>
    %c12_65 = arith.constant 12 : index
    %c16_66 = arith.constant 16 : index
    %121 = vector.load %arg5[%c12_65, %c16_66] : memref<16x32xf32, #tpu.memory_space<vmem>>, vector<2x16xf32>
    tpu.vector_store %arg5[%c12_65, %c16_66], %120 {strides = array<i32>} : memref<16x32xf32, #tpu.memory_space<vmem>>, vector<2x16xf32>,
    %c4_67 = arith.constant 4 : index
    %c0_68 = arith.constant 0 : index
    %122 = vector.load %arg4[%c4_67, %c0_68] : memref<16x96xf32, #tpu.memory_space<vmem>>, vector<2x96xf32>
    %cst_69 = arith.constant dense<0.000000e+00> : vector<2x96xf32>
    %123 = tpu.matmul %117, %3, %cst_69 {dimension_numbers = #tpu.dot_dimension_numbers<[1], [0], [0], [1], [0, 0, 1, 1], [], []>} : vector<2x32xf32>, vector<32x96xf32>, vector<2x96xf32> -> vector<2x96xf32>
    %124 = vector.broadcast %4 : vector<1x96xf32> to vector<2x96xf32>
    %125 = arith.addf %123, %124 : vector<2x96xf32>
    %126 = vector.extract_strided_slice %122 {offsets = [0, 0], sizes = [2, 64], strides = [1, 1]} : vector<2x96xf32> to vector<2x64xf32>
    %127 = vector.extract_strided_slice %125 {offsets = [0, 0], sizes = [2, 64], strides = [1, 1]} : vector<2x96xf32> to vector<2x64xf32>
    %128 = arith.addf %126, %127 : vector<2x64xf32>
    %cst_70 = arith.constant 5.000000e-01 : f32
    %129 = vector.broadcast %cst_70 : f32 to vector<2x64xf32>
    %130 = arith.mulf %129, %128 : vector<2x64xf32>
    %131 = math.tanh %130 : vector<2x64xf32>
    %cst_71 = arith.constant 5.000000e-01 : f32
    %132 = vector.broadcast %cst_71 : f32 to vector<2x64xf32>
    %133 = arith.mulf %132, %131 : vector<2x64xf32>
    %cst_72 = arith.constant 5.000000e-01 : f32
    %134 = vector.broadcast %cst_72 : f32 to vector<2x64xf32>
    %135 = arith.addf %133, %134 : vector<2x64xf32>
    %136 = vector.extract_strided_slice %135 {offsets = [0, 0], sizes = [2, 32], strides = [1, 1]} : vector<2x64xf32> to vector<2x32xf32>
    %137 = vector.extract_strided_slice %135 {offsets = [0, 32], sizes = [2, 32], strides = [1, 1]} : vector<2x64xf32> to vector<2x32xf32>
    %138 = vector.extract_strided_slice %122 {offsets = [0, 64], sizes = [2, 32], strides = [1, 1]} : vector<2x96xf32> to vector<2x32xf32>
    %139 = vector.extract_strided_slice %125 {offsets = [0, 64], sizes = [2, 32], strides = [1, 1]} : vector<2x96xf32> to vector<2x32xf32>
    %140 = arith.mulf %136, %139 : vector<2x32xf32>
    %141 = arith.addf %138, %140 : vector<2x32xf32>
    %142 = math.tanh %141 : vector<2x32xf32>
    %143 = arith.subf %117, %142 : vector<2x32xf32>
    %144 = arith.mulf %137, %143 : vector<2x32xf32>
    %145 = arith.addf %142, %144 : vector<2x32xf32>
    %146 = vector.extract_strided_slice %145 {offsets = [0, 0], sizes = [2, 16], strides = [1, 1]} : vector<2x32xf32> to vector<2x16xf32>
    %c4_73 = arith.constant 4 : index
    %c0_74 = arith.constant 0 : index
    %147 = vector.load %arg5[%c4_73, %c0_74] : memref<16x32xf32, #tpu.memory_space<vmem>>, vector<2x16xf32>
    tpu.vector_store %arg5[%c4_73, %c0_74], %146 {strides = array<i32>} : memref<16x32xf32, #tpu.memory_space<vmem>>, vector<2x16xf32>,
    %148 = vector.extract_strided_slice %145 {offsets = [0, 16], sizes = [2, 16], strides = [1, 1]} : vector<2x32xf32> to vector<2x16xf32>
    %c10_75 = arith.constant 10 : index
    %c16_76 = arith.constant 16 : index
    %149 = vector.load %arg5[%c10_75, %c16_76] : memref<16x32xf32, #tpu.memory_space<vmem>>, vector<2x16xf32>
    tpu.vector_store %arg5[%c10_75, %c16_76], %148 {strides = array<i32>} : memref<16x32xf32, #tpu.memory_space<vmem>>, vector<2x16xf32>,
    %c6_77 = arith.constant 6 : index
    %c0_78 = arith.constant 0 : index
    %150 = vector.load %arg4[%c6_77, %c0_78] : memref<16x96xf32, #tpu.memory_space<vmem>>, vector<2x96xf32>
    %cst_79 = arith.constant dense<0.000000e+00> : vector<2x96xf32>
    %151 = tpu.matmul %145, %3, %cst_79 {dimension_numbers = #tpu.dot_dimension_numbers<[1], [0], [0], [1], [0, 0, 1, 1], [], []>} : vector<2x32xf32>, vector<32x96xf32>, vector<2x96xf32> -> vector<2x96xf32>
    %152 = vector.broadcast %4 : vector<1x96xf32> to vector<2x96xf32>
    %153 = arith.addf %151, %152 : vector<2x96xf32>
    %154 = vector.extract_strided_slice %150 {offsets = [0, 0], sizes = [2, 64], strides = [1, 1]} : vector<2x96xf32> to vector<2x64xf32>
    %155 = vector.extract_strided_slice %153 {offsets = [0, 0], sizes = [2, 64], strides = [1, 1]} : vector<2x96xf32> to vector<2x64xf32>
    %156 = arith.addf %154, %155 : vector<2x64xf32>
    %cst_80 = arith.constant 5.000000e-01 : f32
    %157 = vector.broadcast %cst_80 : f32 to vector<2x64xf32>
    %158 = arith.mulf %157, %156 : vector<2x64xf32>
    %159 = math.tanh %158 : vector<2x64xf32>
    %cst_81 = arith.constant 5.000000e-01 : f32
    %160 = vector.broadcast %cst_81 : f32 to vector<2x64xf32>
    %161 = arith.mulf %160, %159 : vector<2x64xf32>
    %cst_82 = arith.constant 5.000000e-01 : f32
    %162 = vector.broadcast %cst_82 : f32 to vector<2x64xf32>
    %163 = arith.addf %161, %162 : vector<2x64xf32>
    %164 = vector.extract_strided_slice %163 {offsets = [0, 0], sizes = [2, 32], strides = [1, 1]} : vector<2x64xf32> to vector<2x32xf32>
    %165 = vector.extract_strided_slice %163 {offsets = [0, 32], sizes = [2, 32], strides = [1, 1]} : vector<2x64xf32> to vector<2x32xf32>
    %166 = vector.extract_strided_slice %150 {offsets = [0, 64], sizes = [2, 32], strides = [1, 1]} : vector<2x96xf32> to vector<2x32xf32>
    %167 = vector.extract_strided_slice %153 {offsets = [0, 64], sizes = [2, 32], strides = [1, 1]} : vector<2x96xf32> to vector<2x32xf32>
    %168 = arith.mulf %164, %167 : vector<2x32xf32>
    %169 = arith.addf %166, %168 : vector<2x32xf32>
    %170 = math.tanh %169 : vector<2x32xf32>
    %171 = arith.subf %145, %170 : vector<2x32xf32>
    %172 = arith.mulf %165, %171 : vector<2x32xf32>
    %173 = arith.addf %170, %172 : vector<2x32xf32>
    %174 = vector.extract_strided_slice %173 {offsets = [0, 0], sizes = [2, 16], strides = [1, 1]} : vector<2x32xf32> to vector<2x16xf32>
    %c6_83 = arith.constant 6 : index
    %c0_84 = arith.constant 0 : index
    %175 = vector.load %arg5[%c6_83, %c0_84] : memref<16x32xf32, #tpu.memory_space<vmem>>, vector<2x16xf32>
    tpu.vector_store %arg5[%c6_83, %c0_84], %174 {strides = array<i32>} : memref<16x32xf32, #tpu.memory_space<vmem>>, vector<2x16xf32>,
    %176 = vector.extract_strided_slice %173 {offsets = [0, 16], sizes = [2, 16], strides = [1, 1]} : vector<2x32xf32> to vector<2x16xf32>
    %c8_85 = arith.constant 8 : index
    %c16_86 = arith.constant 16 : index
    %177 = vector.load %arg5[%c8_85, %c16_86] : memref<16x32xf32, #tpu.memory_space<vmem>>, vector<2x16xf32>
    tpu.vector_store %arg5[%c8_85, %c16_86], %176 {strides = array<i32>} : memref<16x32xf32, #tpu.memory_space<vmem>>, vector<2x16xf32>,
    %c8_87 = arith.constant 8 : index
    %c0_88 = arith.constant 0 : index
    %178 = vector.load %arg4[%c8_87, %c0_88] : memref<16x96xf32, #tpu.memory_space<vmem>>, vector<2x96xf32>
    %cst_89 = arith.constant dense<0.000000e+00> : vector<2x96xf32>
    %179 = tpu.matmul %173, %3, %cst_89 {dimension_numbers = #tpu.dot_dimension_numbers<[1], [0], [0], [1], [0, 0, 1, 1], [], []>} : vector<2x32xf32>, vector<32x96xf32>, vector<2x96xf32> -> vector<2x96xf32>
    %180 = vector.broadcast %4 : vector<1x96xf32> to vector<2x96xf32>
    %181 = arith.addf %179, %180 : vector<2x96xf32>
    %182 = vector.extract_strided_slice %178 {offsets = [0, 0], sizes = [2, 64], strides = [1, 1]} : vector<2x96xf32> to vector<2x64xf32>
    %183 = vector.extract_strided_slice %181 {offsets = [0, 0], sizes = [2, 64], strides = [1, 1]} : vector<2x96xf32> to vector<2x64xf32>
    %184 = arith.addf %182, %183 : vector<2x64xf32>
    %cst_90 = arith.constant 5.000000e-01 : f32
    %185 = vector.broadcast %cst_90 : f32 to vector<2x64xf32>
    %186 = arith.mulf %185, %184 : vector<2x64xf32>
    %187 = math.tanh %186 : vector<2x64xf32>
    %cst_91 = arith.constant 5.000000e-01 : f32
    %188 = vector.broadcast %cst_91 : f32 to vector<2x64xf32>
    %189 = arith.mulf %188, %187 : vector<2x64xf32>
    %cst_92 = arith.constant 5.000000e-01 : f32
    %190 = vector.broadcast %cst_92 : f32 to vector<2x64xf32>
    %191 = arith.addf %189, %190 : vector<2x64xf32>
    %192 = vector.extract_strided_slice %191 {offsets = [0, 0], sizes = [2, 32], strides = [1, 1]} : vector<2x64xf32> to vector<2x32xf32>
    %193 = vector.extract_strided_slice %191 {offsets = [0, 32], sizes = [2, 32], strides = [1, 1]} : vector<2x64xf32> to vector<2x32xf32>
    %194 = vector.extract_strided_slice %178 {offsets = [0, 64], sizes = [2, 32], strides = [1, 1]} : vector<2x96xf32> to vector<2x32xf32>
    %195 = vector.extract_strided_slice %181 {offsets = [0, 64], sizes = [2, 32], strides = [1, 1]} : vector<2x96xf32> to vector<2x32xf32>
    %196 = arith.mulf %192, %195 : vector<2x32xf32>
    %197 = arith.addf %194, %196 : vector<2x32xf32>
    %198 = math.tanh %197 : vector<2x32xf32>
    %199 = arith.subf %173, %198 : vector<2x32xf32>
    %200 = arith.mulf %193, %199 : vector<2x32xf32>
    %201 = arith.addf %198, %200 : vector<2x32xf32>
    %202 = vector.extract_strided_slice %201 {offsets = [0, 0], sizes = [2, 16], strides = [1, 1]} : vector<2x32xf32> to vector<2x16xf32>
    %c8_93 = arith.constant 8 : index
    %c0_94 = arith.constant 0 : index
    %203 = vector.load %arg5[%c8_93, %c0_94] : memref<16x32xf32, #tpu.memory_space<vmem>>, vector<2x16xf32>
    tpu.vector_store %arg5[%c8_93, %c0_94], %202 {strides = array<i32>} : memref<16x32xf32, #tpu.memory_space<vmem>>, vector<2x16xf32>,
    %204 = vector.extract_strided_slice %201 {offsets = [0, 16], sizes = [2, 16], strides = [1, 1]} : vector<2x32xf32> to vector<2x16xf32>
    %c6_95 = arith.constant 6 : index
    %c16_96 = arith.constant 16 : index
    %205 = vector.load %arg5[%c6_95, %c16_96] : memref<16x32xf32, #tpu.memory_space<vmem>>, vector<2x16xf32>
    tpu.vector_store %arg5[%c6_95, %c16_96], %204 {strides = array<i32>} : memref<16x32xf32, #tpu.memory_space<vmem>>, vector<2x16xf32>,
    %c10_97 = arith.constant 10 : index
    %c0_98 = arith.constant 0 : index
    %206 = vector.load %arg4[%c10_97, %c0_98] : memref<16x96xf32, #tpu.memory_space<vmem>>, vector<2x96xf32>
    %cst_99 = arith.constant dense<0.000000e+00> : vector<2x96xf32>
    %207 = tpu.matmul %201, %3, %cst_99 {dimension_numbers = #tpu.dot_dimension_numbers<[1], [0], [0], [1], [0, 0, 1, 1], [], []>} : vector<2x32xf32>, vector<32x96xf32>, vector<2x96xf32> -> vector<2x96xf32>
    %208 = vector.broadcast %4 : vector<1x96xf32> to vector<2x96xf32>
    %209 = arith.addf %207, %208 : vector<2x96xf32>
    %210 = vector.extract_strided_slice %206 {offsets = [0, 0], sizes = [2, 64], strides = [1, 1]} : vector<2x96xf32> to vector<2x64xf32>
    %211 = vector.extract_strided_slice %209 {offsets = [0, 0], sizes = [2, 64], strides = [1, 1]} : vector<2x96xf32> to vector<2x64xf32>
    %212 = arith.addf %210, %211 : vector<2x64xf32>
    %cst_100 = arith.constant 5.000000e-01 : f32
    %213 = vector.broadcast %cst_100 : f32 to vector<2x64xf32>
    %214 = arith.mulf %213, %212 : vector<2x64xf32>
    %215 = math.tanh %214 : vector<2x64xf32>
    %cst_101 = arith.constant 5.000000e-01 : f32
    %216 = vector.broadcast %cst_101 : f32 to vector<2x64xf32>
    %217 = arith.mulf %216, %215 : vector<2x64xf32>
    %cst_102 = arith.constant 5.000000e-01 : f32
    %218 = vector.broadcast %cst_102 : f32 to vector<2x64xf32>
    %219 = arith.addf %217, %218 : vector<2x64xf32>
    %220 = vector.extract_strided_slice %219 {offsets = [0, 0], sizes = [2, 32], strides = [1, 1]} : vector<2x64xf32> to vector<2x32xf32>
    %221 = vector.extract_strided_slice %219 {offsets = [0, 32], sizes = [2, 32], strides = [1, 1]} : vector<2x64xf32> to vector<2x32xf32>
    %222 = vector.extract_strided_slice %206 {offsets = [0, 64], sizes = [2, 32], strides = [1, 1]} : vector<2x96xf32> to vector<2x32xf32>
    %223 = vector.extract_strided_slice %209 {offsets = [0, 64], sizes = [2, 32], strides = [1, 1]} : vector<2x96xf32> to vector<2x32xf32>
    %224 = arith.mulf %220, %223 : vector<2x32xf32>
    %225 = arith.addf %222, %224 : vector<2x32xf32>
    %226 = math.tanh %225 : vector<2x32xf32>
    %227 = arith.subf %201, %226 : vector<2x32xf32>
    %228 = arith.mulf %221, %227 : vector<2x32xf32>
    %229 = arith.addf %226, %228 : vector<2x32xf32>
    %230 = vector.extract_strided_slice %229 {offsets = [0, 0], sizes = [2, 16], strides = [1, 1]} : vector<2x32xf32> to vector<2x16xf32>
    %c10_103 = arith.constant 10 : index
    %c0_104 = arith.constant 0 : index
    %231 = vector.load %arg5[%c10_103, %c0_104] : memref<16x32xf32, #tpu.memory_space<vmem>>, vector<2x16xf32>
    tpu.vector_store %arg5[%c10_103, %c0_104], %230 {strides = array<i32>} : memref<16x32xf32, #tpu.memory_space<vmem>>, vector<2x16xf32>,
    %232 = vector.extract_strided_slice %229 {offsets = [0, 16], sizes = [2, 16], strides = [1, 1]} : vector<2x32xf32> to vector<2x16xf32>
    %c4_105 = arith.constant 4 : index
    %c16_106 = arith.constant 16 : index
    %233 = vector.load %arg5[%c4_105, %c16_106] : memref<16x32xf32, #tpu.memory_space<vmem>>, vector<2x16xf32>
    tpu.vector_store %arg5[%c4_105, %c16_106], %232 {strides = array<i32>} : memref<16x32xf32, #tpu.memory_space<vmem>>, vector<2x16xf32>,
    %c12_107 = arith.constant 12 : index
    %c0_108 = arith.constant 0 : index
    %234 = vector.load %arg4[%c12_107, %c0_108] : memref<16x96xf32, #tpu.memory_space<vmem>>, vector<2x96xf32>
    %cst_109 = arith.constant dense<0.000000e+00> : vector<2x96xf32>
    %235 = tpu.matmul %229, %3, %cst_109 {dimension_numbers = #tpu.dot_dimension_numbers<[1], [0], [0], [1], [0, 0, 1, 1], [], []>} : vector<2x32xf32>, vector<32x96xf32>, vector<2x96xf32> -> vector<2x96xf32>
    %236 = vector.broadcast %4 : vector<1x96xf32> to vector<2x96xf32>
    %237 = arith.addf %235, %236 : vector<2x96xf32>
    %238 = vector.extract_strided_slice %234 {offsets = [0, 0], sizes = [2, 64], strides = [1, 1]} : vector<2x96xf32> to vector<2x64xf32>
    %239 = vector.extract_strided_slice %237 {offsets = [0, 0], sizes = [2, 64], strides = [1, 1]} : vector<2x96xf32> to vector<2x64xf32>
    %240 = arith.addf %238, %239 : vector<2x64xf32>
    %cst_110 = arith.constant 5.000000e-01 : f32
    %241 = vector.broadcast %cst_110 : f32 to vector<2x64xf32>
    %242 = arith.mulf %241, %240 : vector<2x64xf32>
    %243 = math.tanh %242 : vector<2x64xf32>
    %cst_111 = arith.constant 5.000000e-01 : f32
    %244 = vector.broadcast %cst_111 : f32 to vector<2x64xf32>
    %245 = arith.mulf %244, %243 : vector<2x64xf32>
    %cst_112 = arith.constant 5.000000e-01 : f32
    %246 = vector.broadcast %cst_112 : f32 to vector<2x64xf32>
    %247 = arith.addf %245, %246 : vector<2x64xf32>
    %248 = vector.extract_strided_slice %247 {offsets = [0, 0], sizes = [2, 32], strides = [1, 1]} : vector<2x64xf32> to vector<2x32xf32>
    %249 = vector.extract_strided_slice %247 {offsets = [0, 32], sizes = [2, 32], strides = [1, 1]} : vector<2x64xf32> to vector<2x32xf32>
    %250 = vector.extract_strided_slice %234 {offsets = [0, 64], sizes = [2, 32], strides = [1, 1]} : vector<2x96xf32> to vector<2x32xf32>
    %251 = vector.extract_strided_slice %237 {offsets = [0, 64], sizes = [2, 32], strides = [1, 1]} : vector<2x96xf32> to vector<2x32xf32>
    %252 = arith.mulf %248, %251 : vector<2x32xf32>
    %253 = arith.addf %250, %252 : vector<2x32xf32>
    %254 = math.tanh %253 : vector<2x32xf32>
    %255 = arith.subf %229, %254 : vector<2x32xf32>
    %256 = arith.mulf %249, %255 : vector<2x32xf32>
    %257 = arith.addf %254, %256 : vector<2x32xf32>
    %258 = vector.extract_strided_slice %257 {offsets = [0, 0], sizes = [2, 16], strides = [1, 1]} : vector<2x32xf32> to vector<2x16xf32>
    %c12_113 = arith.constant 12 : index
    %c0_114 = arith.constant 0 : index
    %259 = vector.load %arg5[%c12_113, %c0_114] : memref<16x32xf32, #tpu.memory_space<vmem>>, vector<2x16xf32>
    tpu.vector_store %arg5[%c12_113, %c0_114], %258 {strides = array<i32>} : memref<16x32xf32, #tpu.memory_space<vmem>>, vector<2x16xf32>,
    %260 = vector.extract_strided_slice %257 {offsets = [0, 16], sizes = [2, 16], strides = [1, 1]} : vector<2x32xf32> to vector<2x16xf32>
    %c2_115 = arith.constant 2 : index
    %c16_116 = arith.constant 16 : index
    %261 = vector.load %arg5[%c2_115, %c16_116] : memref<16x32xf32, #tpu.memory_space<vmem>>, vector<2x16xf32>
    tpu.vector_store %arg5[%c2_115, %c16_116], %260 {strides = array<i32>} : memref<16x32xf32, #tpu.memory_space<vmem>>, vector<2x16xf32>,
    %c14_117 = arith.constant 14 : index
    %c0_118 = arith.constant 0 : index
    %262 = vector.load %arg4[%c14_117, %c0_118] : memref<16x96xf32, #tpu.memory_space<vmem>>, vector<2x96xf32>
    %cst_119 = arith.constant dense<0.000000e+00> : vector<2x96xf32>
    %263 = tpu.matmul %257, %3, %cst_119 {dimension_numbers = #tpu.dot_dimension_numbers<[1], [0], [0], [1], [0, 0, 1, 1], [], []>} : vector<2x32xf32>, vector<32x96xf32>, vector<2x96xf32> -> vector<2x96xf32>
    %264 = vector.broadcast %4 : vector<1x96xf32> to vector<2x96xf32>
    %265 = arith.addf %263, %264 : vector<2x96xf32>
    %266 = vector.extract_strided_slice %262 {offsets = [0, 0], sizes = [2, 64], strides = [1, 1]} : vector<2x96xf32> to vector<2x64xf32>
    %267 = vector.extract_strided_slice %265 {offsets = [0, 0], sizes = [2, 64], strides = [1, 1]} : vector<2x96xf32> to vector<2x64xf32>
    %268 = arith.addf %266, %267 : vector<2x64xf32>
    %cst_120 = arith.constant 5.000000e-01 : f32
    %269 = vector.broadcast %cst_120 : f32 to vector<2x64xf32>
    %270 = arith.mulf %269, %268 : vector<2x64xf32>
    %271 = math.tanh %270 : vector<2x64xf32>
    %cst_121 = arith.constant 5.000000e-01 : f32
    %272 = vector.broadcast %cst_121 : f32 to vector<2x64xf32>
    %273 = arith.mulf %272, %271 : vector<2x64xf32>
    %cst_122 = arith.constant 5.000000e-01 : f32
    %274 = vector.broadcast %cst_122 : f32 to vector<2x64xf32>
    %275 = arith.addf %273, %274 : vector<2x64xf32>
    %276 = vector.extract_strided_slice %275 {offsets = [0, 0], sizes = [2, 32], strides = [1, 1]} : vector<2x64xf32> to vector<2x32xf32>
    %277 = vector.extract_strided_slice %275 {offsets = [0, 32], sizes = [2, 32], strides = [1, 1]} : vector<2x64xf32> to vector<2x32xf32>
    %278 = vector.extract_strided_slice %262 {offsets = [0, 64], sizes = [2, 32], strides = [1, 1]} : vector<2x96xf32> to vector<2x32xf32>
    %279 = vector.extract_strided_slice %265 {offsets = [0, 64], sizes = [2, 32], strides = [1, 1]} : vector<2x96xf32> to vector<2x32xf32>
    %280 = arith.mulf %276, %279 : vector<2x32xf32>
    %281 = arith.addf %278, %280 : vector<2x32xf32>
    %282 = math.tanh %281 : vector<2x32xf32>
    %283 = arith.subf %257, %282 : vector<2x32xf32>
    %284 = arith.mulf %277, %283 : vector<2x32xf32>
    %285 = arith.addf %282, %284 : vector<2x32xf32>
    %286 = vector.extract_strided_slice %285 {offsets = [0, 0], sizes = [2, 16], strides = [1, 1]} : vector<2x32xf32> to vector<2x16xf32>
    %c14_123 = arith.constant 14 : index
    %c0_124 = arith.constant 0 : index
    %287 = vector.load %arg5[%c14_123, %c0_124] : memref<16x32xf32, #tpu.memory_space<vmem>>, vector<2x16xf32>
    tpu.vector_store %arg5[%c14_123, %c0_124], %286 {strides = array<i32>} : memref<16x32xf32, #tpu.memory_space<vmem>>, vector<2x16xf32>,
    %288 = vector.extract_strided_slice %285 {offsets = [0, 16], sizes = [2, 16], strides = [1, 1]} : vector<2x32xf32> to vector<2x16xf32>
    %c0_125 = arith.constant 0 : index
    %c16_126 = arith.constant 16 : index
    %289 = vector.load %arg5[%c0_125, %c16_126] : memref<16x32xf32, #tpu.memory_space<vmem>>, vector<2x16xf32>
    tpu.vector_store %arg5[%c0_125, %c16_126], %288 {strides = array<i32>} : memref<16x32xf32, #tpu.memory_space<vmem>>, vector<2x16xf32>,
    %c0_127 = arith.constant 0 : index
    %c0_128 = arith.constant 0 : index
    %290 = vector.load %arg5[%c0_127, %c0_128] : memref<16x32xf32, #tpu.memory_space<vmem>>, vector<16x32xf32>
    %c80_129 = arith.constant 80 : index
    %c0_130 = arith.constant 0 : index
    %291 = vector.load %arg1[%c80_129, %c0_130] : memref<256x96xf32, #tpu.memory_space<vmem>>, vector<32x96xf32>
    %c112 = arith.constant 112 : index
    %c0_131 = arith.constant 0 : index
    %292 = vector.load %arg1[%c112, %c0_131] : memref<256x96xf32, #tpu.memory_space<vmem>>, vector<1x96xf32>
    %c120 = arith.constant 120 : index
    %c0_132 = arith.constant 0 : index
    %293 = vector.load %arg1[%c120, %c0_132] : memref<256x96xf32, #tpu.memory_space<vmem>>, vector<32x96xf32>
    %c152 = arith.constant 152 : index
    %c0_133 = arith.constant 0 : index
    %294 = vector.load %arg1[%c152, %c0_133] : memref<256x96xf32, #tpu.memory_space<vmem>>, vector<1x96xf32>
    %cst_134 = arith.constant dense<0.000000e+00> : vector<16x96xf32>
    %295 = tpu.matmul %290, %291, %cst_134 {dimension_numbers = #tpu.dot_dimension_numbers<[1], [0], [0], [1], [0, 0, 1, 1], [], []>} : vector<16x32xf32>, vector<32x96xf32>, vector<16x96xf32> -> vector<16x96xf32>
    %296 = vector.broadcast %292 : vector<1x96xf32> to vector<16x96xf32>
    %297 = arith.addf %295, %296 : vector<16x96xf32>
    %c0_135 = arith.constant 0 : index
    %c0_136 = arith.constant 0 : index
    %298 = vector.load %arg4[%c0_135, %c0_136] : memref<16x96xf32, #tpu.memory_space<vmem>>, vector<16x96xf32>
    tpu.vector_store %arg4[%c0_135, %c0_136], %297 {strides = array<i32>} : memref<16x96xf32, #tpu.memory_space<vmem>>, vector<16x96xf32>,
    %299 = vector.extract_strided_slice %297 {offsets = [14, 0], sizes = [2, 96], strides = [1, 1]} : vector<16x96xf32> to vector<2x96xf32>
    %300 = vector.extract_strided_slice %299 {offsets = [0, 16], sizes = [2, 16], strides = [1, 1]} : vector<2x96xf32> to vector<2x16xf32>
    %c0_137 = arith.constant 0 : index
    %c16_138 = arith.constant 16 : index
    %301 = vector.load %arg4[%c0_137, %c16_138] : memref<16x96xf32, #tpu.memory_space<vmem>>, vector<2x16xf32>
    tpu.vector_store %arg4[%c0_137, %c16_138], %300 {strides = array<i32>} : memref<16x96xf32, #tpu.memory_space<vmem>>, vector<2x16xf32>,
    %302 = vector.extract_strided_slice %299 {offsets = [0, 48], sizes = [2, 16], strides = [1, 1]} : vector<2x96xf32> to vector<2x16xf32>
    %c0_139 = arith.constant 0 : index
    %c48_140 = arith.constant 48 : index
    %303 = vector.load %arg4[%c0_139, %c48_140] : memref<16x96xf32, #tpu.memory_space<vmem>>, vector<2x16xf32>
    tpu.vector_store %arg4[%c0_139, %c48_140], %302 {strides = array<i32>} : memref<16x96xf32, #tpu.memory_space<vmem>>, vector<2x16xf32>,
    %304 = vector.extract_strided_slice %299 {offsets = [0, 80], sizes = [2, 16], strides = [1, 1]} : vector<2x96xf32> to vector<2x16xf32>
    %c0_141 = arith.constant 0 : index
    %c80_142 = arith.constant 80 : index
    %305 = vector.load %arg4[%c0_141, %c80_142] : memref<16x96xf32, #tpu.memory_space<vmem>>, vector<2x16xf32>
    tpu.vector_store %arg4[%c0_141, %c80_142], %304 {strides = array<i32>} : memref<16x96xf32, #tpu.memory_space<vmem>>, vector<2x16xf32>,
    %306 = vector.extract_strided_slice %297 {offsets = [12, 0], sizes = [2, 96], strides = [1, 1]} : vector<16x96xf32> to vector<2x96xf32>
    %307 = vector.extract_strided_slice %306 {offsets = [0, 16], sizes = [2, 16], strides = [1, 1]} : vector<2x96xf32> to vector<2x16xf32>
    %c2_143 = arith.constant 2 : index
    %c16_144 = arith.constant 16 : index
    %308 = vector.load %arg4[%c2_143, %c16_144] : memref<16x96xf32, #tpu.memory_space<vmem>>, vector<2x16xf32>
    tpu.vector_store %arg4[%c2_143, %c16_144], %307 {strides = array<i32>} : memref<16x96xf32, #tpu.memory_space<vmem>>, vector<2x16xf32>,
    %309 = vector.extract_strided_slice %306 {offsets = [0, 48], sizes = [2, 16], strides = [1, 1]} : vector<2x96xf32> to vector<2x16xf32>
    %c2_145 = arith.constant 2 : index
    %c48_146 = arith.constant 48 : index
    %310 = vector.load %arg4[%c2_145, %c48_146] : memref<16x96xf32, #tpu.memory_space<vmem>>, vector<2x16xf32>
    tpu.vector_store %arg4[%c2_145, %c48_146], %309 {strides = array<i32>} : memref<16x96xf32, #tpu.memory_space<vmem>>, vector<2x16xf32>,
    %311 = vector.extract_strided_slice %306 {offsets = [0, 80], sizes = [2, 16], strides = [1, 1]} : vector<2x96xf32> to vector<2x16xf32>
    %c2_147 = arith.constant 2 : index
    %c80_148 = arith.constant 80 : index
    %312 = vector.load %arg4[%c2_147, %c80_148] : memref<16x96xf32, #tpu.memory_space<vmem>>, vector<2x16xf32>
    tpu.vector_store %arg4[%c2_147, %c80_148], %311 {strides = array<i32>} : memref<16x96xf32, #tpu.memory_space<vmem>>, vector<2x16xf32>,
    %313 = vector.extract_strided_slice %297 {offsets = [10, 0], sizes = [2, 96], strides = [1, 1]} : vector<16x96xf32> to vector<2x96xf32>
    %314 = vector.extract_strided_slice %313 {offsets = [0, 16], sizes = [2, 16], strides = [1, 1]} : vector<2x96xf32> to vector<2x16xf32>
    %c4_149 = arith.constant 4 : index
    %c16_150 = arith.constant 16 : index
    %315 = vector.load %arg4[%c4_149, %c16_150] : memref<16x96xf32, #tpu.memory_space<vmem>>, vector<2x16xf32>
    tpu.vector_store %arg4[%c4_149, %c16_150], %314 {strides = array<i32>} : memref<16x96xf32, #tpu.memory_space<vmem>>, vector<2x16xf32>,
    %316 = vector.extract_strided_slice %313 {offsets = [0, 48], sizes = [2, 16], strides = [1, 1]} : vector<2x96xf32> to vector<2x16xf32>
    %c4_151 = arith.constant 4 : index
    %c48_152 = arith.constant 48 : index
    %317 = vector.load %arg4[%c4_151, %c48_152] : memref<16x96xf32, #tpu.memory_space<vmem>>, vector<2x16xf32>
    tpu.vector_store %arg4[%c4_151, %c48_152], %316 {strides = array<i32>} : memref<16x96xf32, #tpu.memory_space<vmem>>, vector<2x16xf32>,
    %318 = vector.extract_strided_slice %313 {offsets = [0, 80], sizes = [2, 16], strides = [1, 1]} : vector<2x96xf32> to vector<2x16xf32>
    %c4_153 = arith.constant 4 : index
    %c80_154 = arith.constant 80 : index
    %319 = vector.load %arg4[%c4_153, %c80_154] : memref<16x96xf32, #tpu.memory_space<vmem>>, vector<2x16xf32>
    tpu.vector_store %arg4[%c4_153, %c80_154], %318 {strides = array<i32>} : memref<16x96xf32, #tpu.memory_space<vmem>>, vector<2x16xf32>,
    %320 = vector.extract_strided_slice %297 {offsets = [8, 0], sizes = [2, 96], strides = [1, 1]} : vector<16x96xf32> to vector<2x96xf32>
    %321 = vector.extract_strided_slice %320 {offsets = [0, 16], sizes = [2, 16], strides = [1, 1]} : vector<2x96xf32> to vector<2x16xf32>
    %c6_155 = arith.constant 6 : index
    %c16_156 = arith.constant 16 : index
    %322 = vector.load %arg4[%c6_155, %c16_156] : memref<16x96xf32, #tpu.memory_space<vmem>>, vector<2x16xf32>
    tpu.vector_store %arg4[%c6_155, %c16_156], %321 {strides = array<i32>} : memref<16x96xf32, #tpu.memory_space<vmem>>, vector<2x16xf32>,
    %323 = vector.extract_strided_slice %320 {offsets = [0, 48], sizes = [2, 16], strides = [1, 1]} : vector<2x96xf32> to vector<2x16xf32>
    %c6_157 = arith.constant 6 : index
    %c48_158 = arith.constant 48 : index
    %324 = vector.load %arg4[%c6_157, %c48_158] : memref<16x96xf32, #tpu.memory_space<vmem>>, vector<2x16xf32>
    tpu.vector_store %arg4[%c6_157, %c48_158], %323 {strides = array<i32>} : memref<16x96xf32, #tpu.memory_space<vmem>>, vector<2x16xf32>,
    %325 = vector.extract_strided_slice %320 {offsets = [0, 80], sizes = [2, 16], strides = [1, 1]} : vector<2x96xf32> to vector<2x16xf32>
    %c6_159 = arith.constant 6 : index
    %c80_160 = arith.constant 80 : index
    %326 = vector.load %arg4[%c6_159, %c80_160] : memref<16x96xf32, #tpu.memory_space<vmem>>, vector<2x16xf32>
    tpu.vector_store %arg4[%c6_159, %c80_160], %325 {strides = array<i32>} : memref<16x96xf32, #tpu.memory_space<vmem>>, vector<2x16xf32>,
    %327 = vector.extract_strided_slice %297 {offsets = [6, 0], sizes = [2, 96], strides = [1, 1]} : vector<16x96xf32> to vector<2x96xf32>
    %328 = vector.extract_strided_slice %327 {offsets = [0, 16], sizes = [2, 16], strides = [1, 1]} : vector<2x96xf32> to vector<2x16xf32>
    %c8_161 = arith.constant 8 : index
    %c16_162 = arith.constant 16 : index
    %329 = vector.load %arg4[%c8_161, %c16_162] : memref<16x96xf32, #tpu.memory_space<vmem>>, vector<2x16xf32>
    tpu.vector_store %arg4[%c8_161, %c16_162], %328 {strides = array<i32>} : memref<16x96xf32, #tpu.memory_space<vmem>>, vector<2x16xf32>,
    %330 = vector.extract_strided_slice %327 {offsets = [0, 48], sizes = [2, 16], strides = [1, 1]} : vector<2x96xf32> to vector<2x16xf32>
    %c8_163 = arith.constant 8 : index
    %c48_164 = arith.constant 48 : index
    %331 = vector.load %arg4[%c8_163, %c48_164] : memref<16x96xf32, #tpu.memory_space<vmem>>, vector<2x16xf32>
    tpu.vector_store %arg4[%c8_163, %c48_164], %330 {strides = array<i32>} : memref<16x96xf32, #tpu.memory_space<vmem>>, vector<2x16xf32>,
    %332 = vector.extract_strided_slice %327 {offsets = [0, 80], sizes = [2, 16], strides = [1, 1]} : vector<2x96xf32> to vector<2x16xf32>
    %c8_165 = arith.constant 8 : index
    %c80_166 = arith.constant 80 : index
    %333 = vector.load %arg4[%c8_165, %c80_166] : memref<16x96xf32, #tpu.memory_space<vmem>>, vector<2x16xf32>
    tpu.vector_store %arg4[%c8_165, %c80_166], %332 {strides = array<i32>} : memref<16x96xf32, #tpu.memory_space<vmem>>, vector<2x16xf32>,
    %334 = vector.extract_strided_slice %297 {offsets = [4, 0], sizes = [2, 96], strides = [1, 1]} : vector<16x96xf32> to vector<2x96xf32>
    %335 = vector.extract_strided_slice %334 {offsets = [0, 16], sizes = [2, 16], strides = [1, 1]} : vector<2x96xf32> to vector<2x16xf32>
    %c10_167 = arith.constant 10 : index
    %c16_168 = arith.constant 16 : index
    %336 = vector.load %arg4[%c10_167, %c16_168] : memref<16x96xf32, #tpu.memory_space<vmem>>, vector<2x16xf32>
    tpu.vector_store %arg4[%c10_167, %c16_168], %335 {strides = array<i32>} : memref<16x96xf32, #tpu.memory_space<vmem>>, vector<2x16xf32>,
    %337 = vector.extract_strided_slice %334 {offsets = [0, 48], sizes = [2, 16], strides = [1, 1]} : vector<2x96xf32> to vector<2x16xf32>
    %c10_169 = arith.constant 10 : index
    %c48_170 = arith.constant 48 : index
    %338 = vector.load %arg4[%c10_169, %c48_170] : memref<16x96xf32, #tpu.memory_space<vmem>>, vector<2x16xf32>
    tpu.vector_store %arg4[%c10_169, %c48_170], %337 {strides = array<i32>} : memref<16x96xf32, #tpu.memory_space<vmem>>, vector<2x16xf32>,
    %339 = vector.extract_strided_slice %334 {offsets = [0, 80], sizes = [2, 16], strides = [1, 1]} : vector<2x96xf32> to vector<2x16xf32>
    %c10_171 = arith.constant 10 : index
    %c80_172 = arith.constant 80 : index
    %340 = vector.load %arg4[%c10_171, %c80_172] : memref<16x96xf32, #tpu.memory_space<vmem>>, vector<2x16xf32>
    tpu.vector_store %arg4[%c10_171, %c80_172], %339 {strides = array<i32>} : memref<16x96xf32, #tpu.memory_space<vmem>>, vector<2x16xf32>,
    %341 = vector.extract_strided_slice %297 {offsets = [2, 0], sizes = [2, 96], strides = [1, 1]} : vector<16x96xf32> to vector<2x96xf32>
    %342 = vector.extract_strided_slice %341 {offsets = [0, 16], sizes = [2, 16], strides = [1, 1]} : vector<2x96xf32> to vector<2x16xf32>
    %c12_173 = arith.constant 12 : index
    %c16_174 = arith.constant 16 : index
    %343 = vector.load %arg4[%c12_173, %c16_174] : memref<16x96xf32, #tpu.memory_space<vmem>>, vector<2x16xf32>
    tpu.vector_store %arg4[%c12_173, %c16_174], %342 {strides = array<i32>} : memref<16x96xf32, #tpu.memory_space<vmem>>, vector<2x16xf32>,
    %344 = vector.extract_strided_slice %341 {offsets = [0, 48], sizes = [2, 16], strides = [1, 1]} : vector<2x96xf32> to vector<2x16xf32>
    %c12_175 = arith.constant 12 : index
    %c48_176 = arith.constant 48 : index
    %345 = vector.load %arg4[%c12_175, %c48_176] : memref<16x96xf32, #tpu.memory_space<vmem>>, vector<2x16xf32>
    tpu.vector_store %arg4[%c12_175, %c48_176], %344 {strides = array<i32>} : memref<16x96xf32, #tpu.memory_space<vmem>>, vector<2x16xf32>,
    %346 = vector.extract_strided_slice %341 {offsets = [0, 80], sizes = [2, 16], strides = [1, 1]} : vector<2x96xf32> to vector<2x16xf32>
    %c12_177 = arith.constant 12 : index
    %c80_178 = arith.constant 80 : index
    %347 = vector.load %arg4[%c12_177, %c80_178] : memref<16x96xf32, #tpu.memory_space<vmem>>, vector<2x16xf32>
    tpu.vector_store %arg4[%c12_177, %c80_178], %346 {strides = array<i32>} : memref<16x96xf32, #tpu.memory_space<vmem>>, vector<2x16xf32>,
    %348 = vector.extract_strided_slice %297 {offsets = [0, 0], sizes = [2, 96], strides = [1, 1]} : vector<16x96xf32> to vector<2x96xf32>
    %349 = vector.extract_strided_slice %348 {offsets = [0, 16], sizes = [2, 16], strides = [1, 1]} : vector<2x96xf32> to vector<2x16xf32>
    %c14_179 = arith.constant 14 : index
    %c16_180 = arith.constant 16 : index
    %350 = vector.load %arg4[%c14_179, %c16_180] : memref<16x96xf32, #tpu.memory_space<vmem>>, vector<2x16xf32>
    tpu.vector_store %arg4[%c14_179, %c16_180], %349 {strides = array<i32>} : memref<16x96xf32, #tpu.memory_space<vmem>>, vector<2x16xf32>,
    %351 = vector.extract_strided_slice %348 {offsets = [0, 48], sizes = [2, 16], strides = [1, 1]} : vector<2x96xf32> to vector<2x16xf32>
    %c14_181 = arith.constant 14 : index
    %c48_182 = arith.constant 48 : index
    %352 = vector.load %arg4[%c14_181, %c48_182] : memref<16x96xf32, #tpu.memory_space<vmem>>, vector<2x16xf32>
    tpu.vector_store %arg4[%c14_181, %c48_182], %351 {strides = array<i32>} : memref<16x96xf32, #tpu.memory_space<vmem>>, vector<2x16xf32>,
    %353 = vector.extract_strided_slice %348 {offsets = [0, 80], sizes = [2, 16], strides = [1, 1]} : vector<2x96xf32> to vector<2x16xf32>
    %c14_183 = arith.constant 14 : index
    %c80_184 = arith.constant 80 : index
    %354 = vector.load %arg4[%c14_183, %c80_184] : memref<16x96xf32, #tpu.memory_space<vmem>>, vector<2x16xf32>
    tpu.vector_store %arg4[%c14_183, %c80_184], %353 {strides = array<i32>} : memref<16x96xf32, #tpu.memory_space<vmem>>, vector<2x16xf32>,
    %cst_185 = arith.constant 0.000000e+00 : f32
    %355 = vector.broadcast %cst_185 : f32 to vector<2x32xf32>
    %c0_186 = arith.constant 0 : index
    %c0_187 = arith.constant 0 : index
    %356 = vector.load %arg4[%c0_186, %c0_187] : memref<16x96xf32, #tpu.memory_space<vmem>>, vector<2x96xf32>
    %cst_188 = arith.constant dense<0.000000e+00> : vector<2x96xf32>
    %357 = tpu.matmul %355, %293, %cst_188 {dimension_numbers = #tpu.dot_dimension_numbers<[1], [0], [0], [1], [0, 0, 1, 1], [], []>} : vector<2x32xf32>, vector<32x96xf32>, vector<2x96xf32> -> vector<2x96xf32>
    %358 = vector.broadcast %294 : vector<1x96xf32> to vector<2x96xf32>
    %359 = arith.addf %357, %358 : vector<2x96xf32>
    %360 = vector.extract_strided_slice %356 {offsets = [0, 0], sizes = [2, 64], strides = [1, 1]} : vector<2x96xf32> to vector<2x64xf32>
    %361 = vector.extract_strided_slice %359 {offsets = [0, 0], sizes = [2, 64], strides = [1, 1]} : vector<2x96xf32> to vector<2x64xf32>
    %362 = arith.addf %360, %361 : vector<2x64xf32>
    %cst_189 = arith.constant 5.000000e-01 : f32
    %363 = vector.broadcast %cst_189 : f32 to vector<2x64xf32>
    %364 = arith.mulf %363, %362 : vector<2x64xf32>
    %365 = math.tanh %364 : vector<2x64xf32>
    %cst_190 = arith.constant 5.000000e-01 : f32
    %366 = vector.broadcast %cst_190 : f32 to vector<2x64xf32>
    %367 = arith.mulf %366, %365 : vector<2x64xf32>
    %cst_191 = arith.constant 5.000000e-01 : f32
    %368 = vector.broadcast %cst_191 : f32 to vector<2x64xf32>
    %369 = arith.addf %367, %368 : vector<2x64xf32>
    %370 = vector.extract_strided_slice %369 {offsets = [0, 0], sizes = [2, 32], strides = [1, 1]} : vector<2x64xf32> to vector<2x32xf32>
    %371 = vector.extract_strided_slice %369 {offsets = [0, 32], sizes = [2, 32], strides = [1, 1]} : vector<2x64xf32> to vector<2x32xf32>
    %372 = vector.extract_strided_slice %356 {offsets = [0, 64], sizes = [2, 32], strides = [1, 1]} : vector<2x96xf32> to vector<2x32xf32>
    %373 = vector.extract_strided_slice %359 {offsets = [0, 64], sizes = [2, 32], strides = [1, 1]} : vector<2x96xf32> to vector<2x32xf32>
    %374 = arith.mulf %370, %373 : vector<2x32xf32>
    %375 = arith.addf %372, %374 : vector<2x32xf32>
    %376 = math.tanh %375 : vector<2x32xf32>
    %377 = arith.subf %355, %376 : vector<2x32xf32>
    %378 = arith.mulf %371, %377 : vector<2x32xf32>
    %379 = arith.addf %376, %378 : vector<2x32xf32>
    %380 = vector.extract_strided_slice %379 {offsets = [0, 0], sizes = [2, 16], strides = [1, 1]} : vector<2x32xf32> to vector<2x16xf32>
    %c0_192 = arith.constant 0 : index
    %c0_193 = arith.constant 0 : index
    %381 = vector.load %arg5[%c0_192, %c0_193] : memref<16x32xf32, #tpu.memory_space<vmem>>, vector<2x16xf32>
    tpu.vector_store %arg5[%c0_192, %c0_193], %380 {strides = array<i32>} : memref<16x32xf32, #tpu.memory_space<vmem>>, vector<2x16xf32>,
    %382 = vector.extract_strided_slice %379 {offsets = [0, 16], sizes = [2, 16], strides = [1, 1]} : vector<2x32xf32> to vector<2x16xf32>
    %c14_194 = arith.constant 14 : index
    %c16_195 = arith.constant 16 : index
    %383 = vector.load %arg5[%c14_194, %c16_195] : memref<16x32xf32, #tpu.memory_space<vmem>>, vector<2x16xf32>
    tpu.vector_store %arg5[%c14_194, %c16_195], %382 {strides = array<i32>} : memref<16x32xf32, #tpu.memory_space<vmem>>, vector<2x16xf32>,
    %c2_196 = arith.constant 2 : index
    %c0_197 = arith.constant 0 : index
    %384 = vector.load %arg4[%c2_196, %c0_197] : memref<16x96xf32, #tpu.memory_space<vmem>>, vector<2x96xf32>
    %cst_198 = arith.constant dense<0.000000e+00> : vector<2x96xf32>
    %385 = tpu.matmul %379, %293, %cst_198 {dimension_numbers = #tpu.dot_dimension_numbers<[1], [0], [0], [1], [0, 0, 1, 1], [], []>} : vector<2x32xf32>, vector<32x96xf32>, vector<2x96xf32> -> vector<2x96xf32>
    %386 = vector.broadcast %294 : vector<1x96xf32> to vector<2x96xf32>
    %387 = arith.addf %385, %386 : vector<2x96xf32>
    %388 = vector.extract_strided_slice %384 {offsets = [0, 0], sizes = [2, 64], strides = [1, 1]} : vector<2x96xf32> to vector<2x64xf32>
    %389 = vector.extract_strided_slice %387 {offsets = [0, 0], sizes = [2, 64], strides = [1, 1]} : vector<2x96xf32> to vector<2x64xf32>
    %390 = arith.addf %388, %389 : vector<2x64xf32>
    %cst_199 = arith.constant 5.000000e-01 : f32
    %391 = vector.broadcast %cst_199 : f32 to vector<2x64xf32>
    %392 = arith.mulf %391, %390 : vector<2x64xf32>
    %393 = math.tanh %392 : vector<2x64xf32>
    %cst_200 = arith.constant 5.000000e-01 : f32
    %394 = vector.broadcast %cst_200 : f32 to vector<2x64xf32>
    %395 = arith.mulf %394, %393 : vector<2x64xf32>
    %cst_201 = arith.constant 5.000000e-01 : f32
    %396 = vector.broadcast %cst_201 : f32 to vector<2x64xf32>
    %397 = arith.addf %395, %396 : vector<2x64xf32>
    %398 = vector.extract_strided_slice %397 {offsets = [0, 0], sizes = [2, 32], strides = [1, 1]} : vector<2x64xf32> to vector<2x32xf32>
    %399 = vector.extract_strided_slice %397 {offsets = [0, 32], sizes = [2, 32], strides = [1, 1]} : vector<2x64xf32> to vector<2x32xf32>
    %400 = vector.extract_strided_slice %384 {offsets = [0, 64], sizes = [2, 32], strides = [1, 1]} : vector<2x96xf32> to vector<2x32xf32>
    %401 = vector.extract_strided_slice %387 {offsets = [0, 64], sizes = [2, 32], strides = [1, 1]} : vector<2x96xf32> to vector<2x32xf32>
    %402 = arith.mulf %398, %401 : vector<2x32xf32>
    %403 = arith.addf %400, %402 : vector<2x32xf32>
    %404 = math.tanh %403 : vector<2x32xf32>
    %405 = arith.subf %379, %404 : vector<2x32xf32>
    %406 = arith.mulf %399, %405 : vector<2x32xf32>
    %407 = arith.addf %404, %406 : vector<2x32xf32>
    %408 = vector.extract_strided_slice %407 {offsets = [0, 0], sizes = [2, 16], strides = [1, 1]} : vector<2x32xf32> to vector<2x16xf32>
    %c2_202 = arith.constant 2 : index
    %c0_203 = arith.constant 0 : index
    %409 = vector.load %arg5[%c2_202, %c0_203] : memref<16x32xf32, #tpu.memory_space<vmem>>, vector<2x16xf32>
    tpu.vector_store %arg5[%c2_202, %c0_203], %408 {strides = array<i32>} : memref<16x32xf32, #tpu.memory_space<vmem>>, vector<2x16xf32>,
    %410 = vector.extract_strided_slice %407 {offsets = [0, 16], sizes = [2, 16], strides = [1, 1]} : vector<2x32xf32> to vector<2x16xf32>
    %c12_204 = arith.constant 12 : index
    %c16_205 = arith.constant 16 : index
    %411 = vector.load %arg5[%c12_204, %c16_205] : memref<16x32xf32, #tpu.memory_space<vmem>>, vector<2x16xf32>
    tpu.vector_store %arg5[%c12_204, %c16_205], %410 {strides = array<i32>} : memref<16x32xf32, #tpu.memory_space<vmem>>, vector<2x16xf32>,
    %c4_206 = arith.constant 4 : index
    %c0_207 = arith.constant 0 : index
    %412 = vector.load %arg4[%c4_206, %c0_207] : memref<16x96xf32, #tpu.memory_space<vmem>>, vector<2x96xf32>
    %cst_208 = arith.constant dense<0.000000e+00> : vector<2x96xf32>
    %413 = tpu.matmul %407, %293, %cst_208 {dimension_numbers = #tpu.dot_dimension_numbers<[1], [0], [0], [1], [0, 0, 1, 1], [], []>} : vector<2x32xf32>, vector<32x96xf32>, vector<2x96xf32> -> vector<2x96xf32>
    %414 = vector.broadcast %294 : vector<1x96xf32> to vector<2x96xf32>
    %415 = arith.addf %413, %414 : vector<2x96xf32>
    %416 = vector.extract_strided_slice %412 {offsets = [0, 0], sizes = [2, 64], strides = [1, 1]} : vector<2x96xf32> to vector<2x64xf32>
    %417 = vector.extract_strided_slice %415 {offsets = [0, 0], sizes = [2, 64], strides = [1, 1]} : vector<2x96xf32> to vector<2x64xf32>
    %418 = arith.addf %416, %417 : vector<2x64xf32>
    %cst_209 = arith.constant 5.000000e-01 : f32
    %419 = vector.broadcast %cst_209 : f32 to vector<2x64xf32>
    %420 = arith.mulf %419, %418 : vector<2x64xf32>
    %421 = math.tanh %420 : vector<2x64xf32>
    %cst_210 = arith.constant 5.000000e-01 : f32
    %422 = vector.broadcast %cst_210 : f32 to vector<2x64xf32>
    %423 = arith.mulf %422, %421 : vector<2x64xf32>
    %cst_211 = arith.constant 5.000000e-01 : f32
    %424 = vector.broadcast %cst_211 : f32 to vector<2x64xf32>
    %425 = arith.addf %423, %424 : vector<2x64xf32>
    %426 = vector.extract_strided_slice %425 {offsets = [0, 0], sizes = [2, 32], strides = [1, 1]} : vector<2x64xf32> to vector<2x32xf32>
    %427 = vector.extract_strided_slice %425 {offsets = [0, 32], sizes = [2, 32], strides = [1, 1]} : vector<2x64xf32> to vector<2x32xf32>
    %428 = vector.extract_strided_slice %412 {offsets = [0, 64], sizes = [2, 32], strides = [1, 1]} : vector<2x96xf32> to vector<2x32xf32>
    %429 = vector.extract_strided_slice %415 {offsets = [0, 64], sizes = [2, 32], strides = [1, 1]} : vector<2x96xf32> to vector<2x32xf32>
    %430 = arith.mulf %426, %429 : vector<2x32xf32>
    %431 = arith.addf %428, %430 : vector<2x32xf32>
    %432 = math.tanh %431 : vector<2x32xf32>
    %433 = arith.subf %407, %432 : vector<2x32xf32>
    %434 = arith.mulf %427, %433 : vector<2x32xf32>
    %435 = arith.addf %432, %434 : vector<2x32xf32>
    %436 = vector.extract_strided_slice %435 {offsets = [0, 0], sizes = [2, 16], strides = [1, 1]} : vector<2x32xf32> to vector<2x16xf32>
    %c4_212 = arith.constant 4 : index
    %c0_213 = arith.constant 0 : index
    %437 = vector.load %arg5[%c4_212, %c0_213] : memref<16x32xf32, #tpu.memory_space<vmem>>, vector<2x16xf32>
    tpu.vector_store %arg5[%c4_212, %c0_213], %436 {strides = array<i32>} : memref<16x32xf32, #tpu.memory_space<vmem>>, vector<2x16xf32>,
    %438 = vector.extract_strided_slice %435 {offsets = [0, 16], sizes = [2, 16], strides = [1, 1]} : vector<2x32xf32> to vector<2x16xf32>
    %c10_214 = arith.constant 10 : index
    %c16_215 = arith.constant 16 : index
    %439 = vector.load %arg5[%c10_214, %c16_215] : memref<16x32xf32, #tpu.memory_space<vmem>>, vector<2x16xf32>
    tpu.vector_store %arg5[%c10_214, %c16_215], %438 {strides = array<i32>} : memref<16x32xf32, #tpu.memory_space<vmem>>, vector<2x16xf32>,
    %c6_216 = arith.constant 6 : index
    %c0_217 = arith.constant 0 : index
    %440 = vector.load %arg4[%c6_216, %c0_217] : memref<16x96xf32, #tpu.memory_space<vmem>>, vector<2x96xf32>
    %cst_218 = arith.constant dense<0.000000e+00> : vector<2x96xf32>
    %441 = tpu.matmul %435, %293, %cst_218 {dimension_numbers = #tpu.dot_dimension_numbers<[1], [0], [0], [1], [0, 0, 1, 1], [], []>} : vector<2x32xf32>, vector<32x96xf32>, vector<2x96xf32> -> vector<2x96xf32>
    %442 = vector.broadcast %294 : vector<1x96xf32> to vector<2x96xf32>
    %443 = arith.addf %441, %442 : vector<2x96xf32>
    %444 = vector.extract_strided_slice %440 {offsets = [0, 0], sizes = [2, 64], strides = [1, 1]} : vector<2x96xf32> to vector<2x64xf32>
    %445 = vector.extract_strided_slice %443 {offsets = [0, 0], sizes = [2, 64], strides = [1, 1]} : vector<2x96xf32> to vector<2x64xf32>
    %446 = arith.addf %444, %445 : vector<2x64xf32>
    %cst_219 = arith.constant 5.000000e-01 : f32
    %447 = vector.broadcast %cst_219 : f32 to vector<2x64xf32>
    %448 = arith.mulf %447, %446 : vector<2x64xf32>
    %449 = math.tanh %448 : vector<2x64xf32>
    %cst_220 = arith.constant 5.000000e-01 : f32
    %450 = vector.broadcast %cst_220 : f32 to vector<2x64xf32>
    %451 = arith.mulf %450, %449 : vector<2x64xf32>
    %cst_221 = arith.constant 5.000000e-01 : f32
    %452 = vector.broadcast %cst_221 : f32 to vector<2x64xf32>
    %453 = arith.addf %451, %452 : vector<2x64xf32>
    %454 = vector.extract_strided_slice %453 {offsets = [0, 0], sizes = [2, 32], strides = [1, 1]} : vector<2x64xf32> to vector<2x32xf32>
    %455 = vector.extract_strided_slice %453 {offsets = [0, 32], sizes = [2, 32], strides = [1, 1]} : vector<2x64xf32> to vector<2x32xf32>
    %456 = vector.extract_strided_slice %440 {offsets = [0, 64], sizes = [2, 32], strides = [1, 1]} : vector<2x96xf32> to vector<2x32xf32>
    %457 = vector.extract_strided_slice %443 {offsets = [0, 64], sizes = [2, 32], strides = [1, 1]} : vector<2x96xf32> to vector<2x32xf32>
    %458 = arith.mulf %454, %457 : vector<2x32xf32>
    %459 = arith.addf %456, %458 : vector<2x32xf32>
    %460 = math.tanh %459 : vector<2x32xf32>
    %461 = arith.subf %435, %460 : vector<2x32xf32>
    %462 = arith.mulf %455, %461 : vector<2x32xf32>
    %463 = arith.addf %460, %462 : vector<2x32xf32>
    %464 = vector.extract_strided_slice %463 {offsets = [0, 0], sizes = [2, 16], strides = [1, 1]} : vector<2x32xf32> to vector<2x16xf32>
    %c6_222 = arith.constant 6 : index
    %c0_223 = arith.constant 0 : index
    %465 = vector.load %arg5[%c6_222, %c0_223] : memref<16x32xf32, #tpu.memory_space<vmem>>, vector<2x16xf32>
    tpu.vector_store %arg5[%c6_222, %c0_223], %464 {strides = array<i32>} : memref<16x32xf32, #tpu.memory_space<vmem>>, vector<2x16xf32>,
    %466 = vector.extract_strided_slice %463 {offsets = [0, 16], sizes = [2, 16], strides = [1, 1]} : vector<2x32xf32> to vector<2x16xf32>
    %c8_224 = arith.constant 8 : index
    %c16_225 = arith.constant 16 : index
    %467 = vector.load %arg5[%c8_224, %c16_225] : memref<16x32xf32, #tpu.memory_space<vmem>>, vector<2x16xf32>
    tpu.vector_store %arg5[%c8_224, %c16_225], %466 {strides = array<i32>} : memref<16x32xf32, #tpu.memory_space<vmem>>, vector<2x16xf32>,
    %c8_226 = arith.constant 8 : index
    %c0_227 = arith.constant 0 : index
    %468 = vector.load %arg4[%c8_226, %c0_227] : memref<16x96xf32, #tpu.memory_space<vmem>>, vector<2x96xf32>
    %cst_228 = arith.constant dense<0.000000e+00> : vector<2x96xf32>
    %469 = tpu.matmul %463, %293, %cst_228 {dimension_numbers = #tpu.dot_dimension_numbers<[1], [0], [0], [1], [0, 0, 1, 1], [], []>} : vector<2x32xf32>, vector<32x96xf32>, vector<2x96xf32> -> vector<2x96xf32>
    %470 = vector.broadcast %294 : vector<1x96xf32> to vector<2x96xf32>
    %471 = arith.addf %469, %470 : vector<2x96xf32>
    %472 = vector.extract_strided_slice %468 {offsets = [0, 0], sizes = [2, 64], strides = [1, 1]} : vector<2x96xf32> to vector<2x64xf32>
    %473 = vector.extract_strided_slice %471 {offsets = [0, 0], sizes = [2, 64], strides = [1, 1]} : vector<2x96xf32> to vector<2x64xf32>
    %474 = arith.addf %472, %473 : vector<2x64xf32>
    %cst_229 = arith.constant 5.000000e-01 : f32
    %475 = vector.broadcast %cst_229 : f32 to vector<2x64xf32>
    %476 = arith.mulf %475, %474 : vector<2x64xf32>
    %477 = math.tanh %476 : vector<2x64xf32>
    %cst_230 = arith.constant 5.000000e-01 : f32
    %478 = vector.broadcast %cst_230 : f32 to vector<2x64xf32>
    %479 = arith.mulf %478, %477 : vector<2x64xf32>
    %cst_231 = arith.constant 5.000000e-01 : f32
    %480 = vector.broadcast %cst_231 : f32 to vector<2x64xf32>
    %481 = arith.addf %479, %480 : vector<2x64xf32>
    %482 = vector.extract_strided_slice %481 {offsets = [0, 0], sizes = [2, 32], strides = [1, 1]} : vector<2x64xf32> to vector<2x32xf32>
    %483 = vector.extract_strided_slice %481 {offsets = [0, 32], sizes = [2, 32], strides = [1, 1]} : vector<2x64xf32> to vector<2x32xf32>
    %484 = vector.extract_strided_slice %468 {offsets = [0, 64], sizes = [2, 32], strides = [1, 1]} : vector<2x96xf32> to vector<2x32xf32>
    %485 = vector.extract_strided_slice %471 {offsets = [0, 64], sizes = [2, 32], strides = [1, 1]} : vector<2x96xf32> to vector<2x32xf32>
    %486 = arith.mulf %482, %485 : vector<2x32xf32>
    %487 = arith.addf %484, %486 : vector<2x32xf32>
    %488 = math.tanh %487 : vector<2x32xf32>
    %489 = arith.subf %463, %488 : vector<2x32xf32>
    %490 = arith.mulf %483, %489 : vector<2x32xf32>
    %491 = arith.addf %488, %490 : vector<2x32xf32>
    %492 = vector.extract_strided_slice %491 {offsets = [0, 0], sizes = [2, 16], strides = [1, 1]} : vector<2x32xf32> to vector<2x16xf32>
    %c8_232 = arith.constant 8 : index
    %c0_233 = arith.constant 0 : index
    %493 = vector.load %arg5[%c8_232, %c0_233] : memref<16x32xf32, #tpu.memory_space<vmem>>, vector<2x16xf32>
    tpu.vector_store %arg5[%c8_232, %c0_233], %492 {strides = array<i32>} : memref<16x32xf32, #tpu.memory_space<vmem>>, vector<2x16xf32>,
    %494 = vector.extract_strided_slice %491 {offsets = [0, 16], sizes = [2, 16], strides = [1, 1]} : vector<2x32xf32> to vector<2x16xf32>
    %c6_234 = arith.constant 6 : index
    %c16_235 = arith.constant 16 : index
    %495 = vector.load %arg5[%c6_234, %c16_235] : memref<16x32xf32, #tpu.memory_space<vmem>>, vector<2x16xf32>
    tpu.vector_store %arg5[%c6_234, %c16_235], %494 {strides = array<i32>} : memref<16x32xf32, #tpu.memory_space<vmem>>, vector<2x16xf32>,
    %c10_236 = arith.constant 10 : index
    %c0_237 = arith.constant 0 : index
    %496 = vector.load %arg4[%c10_236, %c0_237] : memref<16x96xf32, #tpu.memory_space<vmem>>, vector<2x96xf32>
    %cst_238 = arith.constant dense<0.000000e+00> : vector<2x96xf32>
    %497 = tpu.matmul %491, %293, %cst_238 {dimension_numbers = #tpu.dot_dimension_numbers<[1], [0], [0], [1], [0, 0, 1, 1], [], []>} : vector<2x32xf32>, vector<32x96xf32>, vector<2x96xf32> -> vector<2x96xf32>
    %498 = vector.broadcast %294 : vector<1x96xf32> to vector<2x96xf32>
    %499 = arith.addf %497, %498 : vector<2x96xf32>
    %500 = vector.extract_strided_slice %496 {offsets = [0, 0], sizes = [2, 64], strides = [1, 1]} : vector<2x96xf32> to vector<2x64xf32>
    %501 = vector.extract_strided_slice %499 {offsets = [0, 0], sizes = [2, 64], strides = [1, 1]} : vector<2x96xf32> to vector<2x64xf32>
    %502 = arith.addf %500, %501 : vector<2x64xf32>
    %cst_239 = arith.constant 5.000000e-01 : f32
    %503 = vector.broadcast %cst_239 : f32 to vector<2x64xf32>
    %504 = arith.mulf %503, %502 : vector<2x64xf32>
    %505 = math.tanh %504 : vector<2x64xf32>
    %cst_240 = arith.constant 5.000000e-01 : f32
    %506 = vector.broadcast %cst_240 : f32 to vector<2x64xf32>
    %507 = arith.mulf %506, %505 : vector<2x64xf32>
    %cst_241 = arith.constant 5.000000e-01 : f32
    %508 = vector.broadcast %cst_241 : f32 to vector<2x64xf32>
    %509 = arith.addf %507, %508 : vector<2x64xf32>
    %510 = vector.extract_strided_slice %509 {offsets = [0, 0], sizes = [2, 32], strides = [1, 1]} : vector<2x64xf32> to vector<2x32xf32>
    %511 = vector.extract_strided_slice %509 {offsets = [0, 32], sizes = [2, 32], strides = [1, 1]} : vector<2x64xf32> to vector<2x32xf32>
    %512 = vector.extract_strided_slice %496 {offsets = [0, 64], sizes = [2, 32], strides = [1, 1]} : vector<2x96xf32> to vector<2x32xf32>
    %513 = vector.extract_strided_slice %499 {offsets = [0, 64], sizes = [2, 32], strides = [1, 1]} : vector<2x96xf32> to vector<2x32xf32>
    %514 = arith.mulf %510, %513 : vector<2x32xf32>
    %515 = arith.addf %512, %514 : vector<2x32xf32>
    %516 = math.tanh %515 : vector<2x32xf32>
    %517 = arith.subf %491, %516 : vector<2x32xf32>
    %518 = arith.mulf %511, %517 : vector<2x32xf32>
    %519 = arith.addf %516, %518 : vector<2x32xf32>
    %520 = vector.extract_strided_slice %519 {offsets = [0, 0], sizes = [2, 16], strides = [1, 1]} : vector<2x32xf32> to vector<2x16xf32>
    %c10_242 = arith.constant 10 : index
    %c0_243 = arith.constant 0 : index
    %521 = vector.load %arg5[%c10_242, %c0_243] : memref<16x32xf32, #tpu.memory_space<vmem>>, vector<2x16xf32>
    tpu.vector_store %arg5[%c10_242, %c0_243], %520 {strides = array<i32>} : memref<16x32xf32, #tpu.memory_space<vmem>>, vector<2x16xf32>,
    %522 = vector.extract_strided_slice %519 {offsets = [0, 16], sizes = [2, 16], strides = [1, 1]} : vector<2x32xf32> to vector<2x16xf32>
    %c4_244 = arith.constant 4 : index
    %c16_245 = arith.constant 16 : index
    %523 = vector.load %arg5[%c4_244, %c16_245] : memref<16x32xf32, #tpu.memory_space<vmem>>, vector<2x16xf32>
    tpu.vector_store %arg5[%c4_244, %c16_245], %522 {strides = array<i32>} : memref<16x32xf32, #tpu.memory_space<vmem>>, vector<2x16xf32>,
    %c12_246 = arith.constant 12 : index
    %c0_247 = arith.constant 0 : index
    %524 = vector.load %arg4[%c12_246, %c0_247] : memref<16x96xf32, #tpu.memory_space<vmem>>, vector<2x96xf32>
    %cst_248 = arith.constant dense<0.000000e+00> : vector<2x96xf32>
    %525 = tpu.matmul %519, %293, %cst_248 {dimension_numbers = #tpu.dot_dimension_numbers<[1], [0], [0], [1], [0, 0, 1, 1], [], []>} : vector<2x32xf32>, vector<32x96xf32>, vector<2x96xf32> -> vector<2x96xf32>
    %526 = vector.broadcast %294 : vector<1x96xf32> to vector<2x96xf32>
    %527 = arith.addf %525, %526 : vector<2x96xf32>
    %528 = vector.extract_strided_slice %524 {offsets = [0, 0], sizes = [2, 64], strides = [1, 1]} : vector<2x96xf32> to vector<2x64xf32>
    %529 = vector.extract_strided_slice %527 {offsets = [0, 0], sizes = [2, 64], strides = [1, 1]} : vector<2x96xf32> to vector<2x64xf32>
    %530 = arith.addf %528, %529 : vector<2x64xf32>
    %cst_249 = arith.constant 5.000000e-01 : f32
    %531 = vector.broadcast %cst_249 : f32 to vector<2x64xf32>
    %532 = arith.mulf %531, %530 : vector<2x64xf32>
    %533 = math.tanh %532 : vector<2x64xf32>
    %cst_250 = arith.constant 5.000000e-01 : f32
    %534 = vector.broadcast %cst_250 : f32 to vector<2x64xf32>
    %535 = arith.mulf %534, %533 : vector<2x64xf32>
    %cst_251 = arith.constant 5.000000e-01 : f32
    %536 = vector.broadcast %cst_251 : f32 to vector<2x64xf32>
    %537 = arith.addf %535, %536 : vector<2x64xf32>
    %538 = vector.extract_strided_slice %537 {offsets = [0, 0], sizes = [2, 32], strides = [1, 1]} : vector<2x64xf32> to vector<2x32xf32>
    %539 = vector.extract_strided_slice %537 {offsets = [0, 32], sizes = [2, 32], strides = [1, 1]} : vector<2x64xf32> to vector<2x32xf32>
    %540 = vector.extract_strided_slice %524 {offsets = [0, 64], sizes = [2, 32], strides = [1, 1]} : vector<2x96xf32> to vector<2x32xf32>
    %541 = vector.extract_strided_slice %527 {offsets = [0, 64], sizes = [2, 32], strides = [1, 1]} : vector<2x96xf32> to vector<2x32xf32>
    %542 = arith.mulf %538, %541 : vector<2x32xf32>
    %543 = arith.addf %540, %542 : vector<2x32xf32>
    %544 = math.tanh %543 : vector<2x32xf32>
    %545 = arith.subf %519, %544 : vector<2x32xf32>
    %546 = arith.mulf %539, %545 : vector<2x32xf32>
    %547 = arith.addf %544, %546 : vector<2x32xf32>
    %548 = vector.extract_strided_slice %547 {offsets = [0, 0], sizes = [2, 16], strides = [1, 1]} : vector<2x32xf32> to vector<2x16xf32>
    %c12_252 = arith.constant 12 : index
    %c0_253 = arith.constant 0 : index
    %549 = vector.load %arg5[%c12_252, %c0_253] : memref<16x32xf32, #tpu.memory_space<vmem>>, vector<2x16xf32>
    tpu.vector_store %arg5[%c12_252, %c0_253], %548 {strides = array<i32>} : memref<16x32xf32, #tpu.memory_space<vmem>>, vector<2x16xf32>,
    %550 = vector.extract_strided_slice %547 {offsets = [0, 16], sizes = [2, 16], strides = [1, 1]} : vector<2x32xf32> to vector<2x16xf32>
    %c2_254 = arith.constant 2 : index
    %c16_255 = arith.constant 16 : index
    %551 = vector.load %arg5[%c2_254, %c16_255] : memref<16x32xf32, #tpu.memory_space<vmem>>, vector<2x16xf32>
    tpu.vector_store %arg5[%c2_254, %c16_255], %550 {strides = array<i32>} : memref<16x32xf32, #tpu.memory_space<vmem>>, vector<2x16xf32>,
    %c14_256 = arith.constant 14 : index
    %c0_257 = arith.constant 0 : index
    %552 = vector.load %arg4[%c14_256, %c0_257] : memref<16x96xf32, #tpu.memory_space<vmem>>, vector<2x96xf32>
    %cst_258 = arith.constant dense<0.000000e+00> : vector<2x96xf32>
    %553 = tpu.matmul %547, %293, %cst_258 {dimension_numbers = #tpu.dot_dimension_numbers<[1], [0], [0], [1], [0, 0, 1, 1], [], []>} : vector<2x32xf32>, vector<32x96xf32>, vector<2x96xf32> -> vector<2x96xf32>
    %554 = vector.broadcast %294 : vector<1x96xf32> to vector<2x96xf32>
    %555 = arith.addf %553, %554 : vector<2x96xf32>
    %556 = vector.extract_strided_slice %552 {offsets = [0, 0], sizes = [2, 64], strides = [1, 1]} : vector<2x96xf32> to vector<2x64xf32>
    %557 = vector.extract_strided_slice %555 {offsets = [0, 0], sizes = [2, 64], strides = [1, 1]} : vector<2x96xf32> to vector<2x64xf32>
    %558 = arith.addf %556, %557 : vector<2x64xf32>
    %cst_259 = arith.constant 5.000000e-01 : f32
    %559 = vector.broadcast %cst_259 : f32 to vector<2x64xf32>
    %560 = arith.mulf %559, %558 : vector<2x64xf32>
    %561 = math.tanh %560 : vector<2x64xf32>
    %cst_260 = arith.constant 5.000000e-01 : f32
    %562 = vector.broadcast %cst_260 : f32 to vector<2x64xf32>
    %563 = arith.mulf %562, %561 : vector<2x64xf32>
    %cst_261 = arith.constant 5.000000e-01 : f32
    %564 = vector.broadcast %cst_261 : f32 to vector<2x64xf32>
    %565 = arith.addf %563, %564 : vector<2x64xf32>
    %566 = vector.extract_strided_slice %565 {offsets = [0, 0], sizes = [2, 32], strides = [1, 1]} : vector<2x64xf32> to vector<2x32xf32>
    %567 = vector.extract_strided_slice %565 {offsets = [0, 32], sizes = [2, 32], strides = [1, 1]} : vector<2x64xf32> to vector<2x32xf32>
    %568 = vector.extract_strided_slice %552 {offsets = [0, 64], sizes = [2, 32], strides = [1, 1]} : vector<2x96xf32> to vector<2x32xf32>
    %569 = vector.extract_strided_slice %555 {offsets = [0, 64], sizes = [2, 32], strides = [1, 1]} : vector<2x96xf32> to vector<2x32xf32>
    %570 = arith.mulf %566, %569 : vector<2x32xf32>
    %571 = arith.addf %568, %570 : vector<2x32xf32>
    %572 = math.tanh %571 : vector<2x32xf32>
    %573 = arith.subf %547, %572 : vector<2x32xf32>
    %574 = arith.mulf %567, %573 : vector<2x32xf32>
    %575 = arith.addf %572, %574 : vector<2x32xf32>
    %576 = vector.extract_strided_slice %575 {offsets = [0, 0], sizes = [2, 16], strides = [1, 1]} : vector<2x32xf32> to vector<2x16xf32>
    %c14_262 = arith.constant 14 : index
    %c0_263 = arith.constant 0 : index
    %577 = vector.load %arg5[%c14_262, %c0_263] : memref<16x32xf32, #tpu.memory_space<vmem>>, vector<2x16xf32>
    tpu.vector_store %arg5[%c14_262, %c0_263], %576 {strides = array<i32>} : memref<16x32xf32, #tpu.memory_space<vmem>>, vector<2x16xf32>,
    %578 = vector.extract_strided_slice %575 {offsets = [0, 16], sizes = [2, 16], strides = [1, 1]} : vector<2x32xf32> to vector<2x16xf32>
    %c0_264 = arith.constant 0 : index
    %c16_265 = arith.constant 16 : index
    %579 = vector.load %arg5[%c0_264, %c16_265] : memref<16x32xf32, #tpu.memory_space<vmem>>, vector<2x16xf32>
    tpu.vector_store %arg5[%c0_264, %c16_265], %578 {strides = array<i32>} : memref<16x32xf32, #tpu.memory_space<vmem>>, vector<2x16xf32>,
    %c0_266 = arith.constant 0 : index
    %c0_267 = arith.constant 0 : index
    %580 = vector.load %arg5[%c0_266, %c0_267] : memref<16x32xf32, #tpu.memory_space<vmem>>, vector<16x32xf32>
    %c160 = arith.constant 160 : index
    %c0_268 = arith.constant 0 : index
    %581 = vector.load %arg1[%c160, %c0_268] : memref<256x96xf32, #tpu.memory_space<vmem>>, vector<32x32xf32>
    %c192 = arith.constant 192 : index
    %c0_269 = arith.constant 0 : index
    %582 = vector.load %arg1[%c192, %c0_269] : memref<256x96xf32, #tpu.memory_space<vmem>>, vector<1x32xf32>
    %c200 = arith.constant 200 : index
    %c0_270 = arith.constant 0 : index
    %583 = vector.load %arg1[%c200, %c0_270] : memref<256x96xf32, #tpu.memory_space<vmem>>, vector<32x1xf32>
    %c232 = arith.constant 232 : index
    %c0_271 = arith.constant 0 : index
    %584 = vector.load %arg1[%c232, %c0_271] : memref<256x96xf32, #tpu.memory_space<vmem>>, vector<2x16xf32>
    %c240 = arith.constant 240 : index
    %c0_272 = arith.constant 0 : index
    %585 = vector.load %arg1[%c240, %c0_272] : memref<256x96xf32, #tpu.memory_space<vmem>>, vector<16x8xf32>
    %cst_273 = arith.constant dense<0.000000e+00> : vector<16x32xf32>
    %586 = tpu.matmul %580, %581, %cst_273 {dimension_numbers = #tpu.dot_dimension_numbers<[1], [0], [0], [1], [0, 0, 1, 1], [], []>} : vector<16x32xf32>, vector<32x32xf32>, vector<16x32xf32> -> vector<16x32xf32>
    %587 = vector.broadcast %582 : vector<1x32xf32> to vector<16x32xf32>
    %588 = arith.addf %586, %587 : vector<16x32xf32>
    %589 = math.tanh %588 : vector<16x32xf32>
    %cst_274 = arith.constant dense<0.000000e+00> : vector<16x1xf32>
    %590 = tpu.matmul %589, %583, %cst_274 {dimension_numbers = #tpu.dot_dimension_numbers<[1], [0], [0], [1], [0, 0, 1, 1], [], []>} : vector<16x32xf32>, vector<32x1xf32>, vector<16x1xf32> -> vector<16x1xf32>
    %cst_275 = arith.constant dense<0xFF800000> : vector<1xf32>
    %591 = vector.multi_reduction <maximumf>, %590, %cst_275 [0] : vector<16x1xf32> to vector<1xf32>
    %592 = vector.shape_cast %591 : vector<1xf32> to vector<1x1xf32>
    %593 = vector.broadcast %592 : vector<1x1xf32> to vector<16x1xf32>
    %594 = arith.subf %590, %593 : vector<16x1xf32>
    %595 = math.exp %594 : vector<16x1xf32>
    %596 = vector.broadcast %595 : vector<16x1xf32> to vector<16x8xf32>
    %597 = arith.mulf %596, %585 : vector<16x8xf32>
    %cst_276 = arith.constant dense<0.000000e+00> : vector<2x8xf32>
    %598 = tpu.matmul %584, %597, %cst_276 {dimension_numbers = #tpu.dot_dimension_numbers<[1], [0], [0], [1], [0, 0, 1, 1], [], []>} : vector<2x16xf32>, vector<16x8xf32>, vector<2x8xf32> -> vector<2x8xf32>
    %cst_277 = arith.constant dense<0.000000e+00> : vector<2xf32>
    %599 = vector.multi_reduction <add>, %598, %cst_277 [1] : vector<2x8xf32> to vector<2xf32>
    %600 = vector.shape_cast %599 : vector<2xf32> to vector<2x1xf32>
    %601 = tpu.reciprocal %600 {approx = true} : vector<2x1xf32> -> vector<2x1xf32>
    %602 = vector.broadcast %601 : vector<2x1xf32> to vector<2x8xf32>
    %603 = arith.mulf %598, %602 : vector<2x8xf32>
    %c0_278 = arith.constant 0 : index
    %c0_279 = arith.constant 0 : index
    %604 = vector.load %arg2[%c0_278, %c0_279] : memref<2x8xf32, #tpu.memory_space<vmem>>, vector<2x8xf32>
    tpu.vector_store %arg2[%c0_278, %c0_279], %603 {strides = array<i32>} : memref<2x8xf32, #tpu.memory_space<vmem>>, vector<2x8xf32>,
    %605 = vector.broadcast %595 : vector<16x1xf32> to vector<16x32xf32>
    %606 = arith.mulf %605, %580 : vector<16x32xf32>
    %cst_280 = arith.constant dense<0.000000e+00> : vector<2x32xf32>
    %607 = tpu.matmul %584, %606, %cst_280 {dimension_numbers = #tpu.dot_dimension_numbers<[1], [0], [0], [1], [0, 0, 1, 1], [], []>} : vector<2x16xf32>, vector<16x32xf32>, vector<2x32xf32> -> vector<2x32xf32>
    %608 = vector.broadcast %601 : vector<2x1xf32> to vector<2x32xf32>
    %609 = arith.mulf %607, %608 : vector<2x32xf32>
    %c0_281 = arith.constant 0 : index
    %c0_282 = arith.constant 0 : index
    %610 = vector.load %arg3[%c0_281, %c0_282] : memref<2x32xf32, #tpu.memory_space<vmem>>, vector<2x32xf32>
    tpu.vector_store %arg3[%c0_281, %c0_282], %609 {strides = array<i32>} : memref<2x32xf32, #tpu.memory_space<vmem>>, vector<2x32xf32>,
    return
  }
}

</mosaic_0001>

<bundles_post_ra>
// kernel: sent_attn_forward.1
= control target key start
LH: loop header
LB: loop body
LE: loop exit
PB: predicated region body
PF: predicated region fallthrough
CT: control target
= control target key end

     0   :  { %9 = vsyncpa [#allocation5], 0  ;;  %s1719_s0 = inlined_call_operand.vmem [shape: f32[16,32], index: 0, kind: input, shape index: {}]   ;;  %s1720_s1 = inlined_call_operand.hbm [shape: f32[256,96], index: 1, kind: input, shape index: {}]   ;;  %s1721_s2 = inlined_call_operand.hbm [shape: f32[2,8], index: 2, kind: output, shape index: {0}]   ;;  %s1722_s3 = inlined_call_operand.hbm [shape: f32[2,32], index: 3, kind: output, shape index: {1}]  }
   0x1   :  { %10 = vsyncpa [#allocation6], 0 }
   0x2   :  { %11 = vsyncpa [#allocation9], 0  ;;  %s18_s14 = sshll.u32 %s1720_s1, 4  ;;  %s1464_s15 = smov [#allocation4]   ;;  %s19_s14 = int_to_ptr.hbm [resolvable:$true] %s18_s14 }
   0x3   :  { %s20_s16 = sshll.u32 %s1464_s15, 4  ;;  %s1465_s17 = smov 128   ;;  %s21_s16 = int_to_ptr.vmem [resolvable:$true] %s20_s16 }
   0x4   :  { %s1466_s18 = smov 8  }
   0x5   :  { %26 = dma.hbm_to_vmem [thread:$0]  %s19_s14, 4096, %s21_s16, [#allocation5], %s1465_s17, %s1465_s17, %s1466_s18  }
   0x6   :  { %1458 = dma.done.wait [#allocation5], 4096  }
   0x7   :  { %1459 = vsyncadd [#allocation5], 4294963200  ;;  %v36_v0 = vld [vmem:[#allocation4 + $0x18] sm:$0xff]  ;;  %v41_v1 = vld [vmem:[#allocation4 + $0x40] sm:$0xff]  ;;  %vm44_vm0 = vcmask 261120   ;;  %v1467_v9 = vmov 0.0  }
   0x8   :  { %v35_v2 = vld [vmem:[#allocation4 + $0x10] sm:$0xff]  ;;  %63 = vmatpush.msra.mxu0 %v36_v0  ;;  %130 = vmatpush.msra.mxu1 %v41_v1  ;;  %v40_v3 = vld [vmem:[#allocation4 + $0x38] sm:$0xff]  ;;  %v34_v4 = vld [vmem:[#allocation4 + $0x8] sm:$0xff]  ;;  %vm74_vm1 = vcmask 785408   ;;  %vm77_vm2 = vcmask 261254   ;;  %vm79_vm3 = vcmask 523654  }
   0x9   :  { %v39_v5 = vld [vmem:[#allocation4 + $0x30] sm:$0xff]  ;;  %187 = vmatpush.msra.mxu2 %v41_v1  ;;  %243 = vmatpush.msra.mxu3 %v41_v1  ;;  %v33_v6 = vld [vmem:[#allocation4] sm:$0xff]  ;;  %v38_v7 = vld [vmem:[#allocation4 + $0x28] sm:$0xff]  ;;  %vm81_vm4 = vcmask 786054   ;;  %vm95_vm5 = vcmask 255104   ;;  %vm83_vm6 = vcmask 259204  }
   0xa   :  { %64 = vmatpush.msra.mxu0 %v35_v2  ;;  %131 = vmatpush.msra.mxu1 %v40_v3  ;;  %v31_v8 = vld [vmem:[%s1719_s0] sm:$0xff]  ;;  %v32_v10 = vld [vmem:[%s1719_s0 + $0x8] sm:$0xff]  ;;  %s1468_s0 = smov 64   ;;  %vm85_vm7 = vcmask 521604   ;;  %vm87_vm8 = vcmask 784004   ;;  %vm89_vm9 = vcmask 257154  }
   0xb   :  { %188 = vmatpush.msra.mxu2 %v40_v3  ;;  %244 = vmatpush.msra.mxu3 %v40_v3  ;;  %v1307_v11 = vld [vmem:[#allocation4 + $0x20] ss:$0 sm:$0xff]  ;;  %v1506_v12 = vld [vmem:[#allocation4 + $0x48] ss:$0 sm:$0xff]  ;;  %vm91_vm10 = vcmask 519554   ;;  %vm93_vm11 = vcmask 781954  }
   0xc   :  { %65 = vmatpush.msra.mxu0 %v34_v4  ;;  %132 = vmatpush.msra.mxu1 %v39_v5  ;;  %vm97_vm12 = vcmask 517504   ;;  %vm99_vm13 = vcmask 779904   ;;  %s1469_s22 = smov 96   ;;  %s1470_s23 = smov 32   ;;  %vm169_vm14 = vcmask 123904   ;;  %vm1154_vm15 = vcmask 7168  }
   0xd   :  { %189 = vmatpush.msra.mxu2 %v39_v5  ;;  %245 = vmatpush.msra.mxu3 %v39_v5  ;;  %s1472_s24 = smov [#allocation7]   ;;  %s1245_s28 = sshll.u32 %s1721_s2, 4  ;;  %s1246_s28 = int_to_ptr.hbm [resolvable:$true] %s1245_s28 }
   0xe   :  { %66 = vmatpush.msra.mxu0 %v33_v6  ;;  %133 = vmatpush.msra.mxu1 %v38_v7  ;;  %s1243_s25 = sshll.u32 %s1472_s24, 4  ;;  %s1473_s29 = smov [#allocation8]   ;;  %s1244_s25 = int_to_ptr.vmem [resolvable:$true] %s1243_s25 }
   0xf   :  { %1271 = vmatmul.msk.f32.vlgmr.msra.gmra.mxu0 %vm44_vm0, %v31_v8  ;;  %134 = vmatmul.f32.vlgmr.msra.gmra.mxu1 %v1467_v9  ;;  %s1254_s30 = sshll.u32 %s1473_s29, 4  ;;  %s1256_s6 = sshll.u32 %s1722_s3, 4  ;;  %s1255_s30 = int_to_ptr.vmem [resolvable:$true] %s1254_s30  ;;  %s1257_s6 = int_to_ptr.hbm [resolvable:$true] %s1256_s6 }
  0x10   :  { %190 = vmatpush.msra.mxu2 %v38_v7  ;;  %246 = vmatpush.msra.mxu3 %v38_v7 }
  0x11   :  { %299 = vmatpush.msrb.mxu1 %v41_v1  ;;  %467 = vmatpush.msrb.mxu0 %v41_v1 }
  0x12   :  { %355 = vmatpush.msrb.mxu2 %v41_v1  ;;  %411 = vmatpush.msrb.mxu3 %v41_v1 }
  0x13   :  { %300 = vmatpush.msrb.mxu1 %v40_v3  ;;  %468 = vmatpush.msrb.mxu0 %v40_v3 }
  0x14   :  { %356 = vmatpush.msrb.mxu2 %v40_v3  ;;  %412 = vmatpush.msrb.mxu3 %v40_v3 }
  0x15   :  { %301 = vmatpush.msrb.mxu1 %v39_v5  ;;  %469 = vmatpush.msrb.mxu0 %v39_v5 }
  0x16   :  { %357 = vmatpush.msrb.mxu2 %v39_v5  ;;  %413 = vmatpush.msrb.mxu3 %v39_v5 }
  0x17   :  { %1272 = vmatmul.msk.f32.gmra.mxu0 %vm44_vm0, %v32_v10  ;;  %302 = vmatpush.msrb.mxu1 %v38_v7 }
  0x18   :  { %358 = vmatpush.msrb.mxu2 %v38_v7  ;;  %414 = vmatpush.msrb.mxu3 %v38_v7 }
  0x19   :  { %470 = vmatpush.msrb.mxu0 %v38_v7  ;;  %523 = vmatpush.msra.mxu1 %v41_v1 }
  0x1b   :  { %524 = vmatpush.msra.mxu1 %v40_v3 }
  0x1d   :  { %525 = vmatpush.msra.mxu1 %v39_v5 }
  0x1f   :  { %526 = vmatpush.msra.mxu1 %v38_v7 }
  0x8c   :  { %v68_v13 = vpop.f32.mrf.mxu0  ;;  %v135_v14 = vpop.f32.mrf.mxu1 }
  0x8d   :  { %v69_v15 = vadd.f32 %v1307_v11, %v68_v13  ;;  %v136_v16 = vadd.f32 %v1506_v12, %v135_v14 }
  0x8f   :  { %144 = vrot.lane.b32.xlu0 %v136_v16, %s1468_s0  ;;  %75 = vst.msk [vmem:[#allocation2] sm:$0xff] %vm74_vm1, %v69_v15 }
  0x94   :  { %v71_v17 = vpop.f32.mrf.mxu0 }
  0x95   :  { %v72_v18 = vadd.f32 %v1307_v11, %v71_v17 }
  0x97   :  { %78 = vst.msk [vmem:[#allocation2 - $0x6] sm:$0xc0] %vm77_vm2, %v72_v18 }
  0x98   :  { %80 = vst.msk [vmem:[#allocation2 - $0x6] sm:$0xc0] %vm79_vm3, %v72_v18 }
  0x99   :  { %82 = vst.msk [vmem:[#allocation2 - $0x6] sm:$0xc0] %vm81_vm4, %v72_v18 }
  0x9a   :  { %76 = vst.msk [vmem:[#allocation2 + $0x8] sm:$0xff] %vm74_vm1, %v72_v18 }
  0x9b   :  { %101 = vst.msk [vmem:[#allocation2 + $0x2] sm:$0xc0] %vm77_vm2, %v69_v15 }
  0x9c   :  { %102 = vst.msk [vmem:[#allocation2 + $0x2] sm:$0xc0] %vm79_vm3, %v69_v15 }
  0x9d   :  { %103 = vst.msk [vmem:[#allocation2 + $0x2] sm:$0xc0] %vm81_vm4, %v69_v15 }
  0x9e   :  { %96 = vst.msk [vmem:[#allocation2 + $0x6] sm:$0x3] %vm95_vm5, %v72_v18 }
  0x9f   :  { %110 = vst.msk [vmem:[#allocation2 + $0xe] sm:$0x3] %vm95_vm5, %v69_v15 }
  0xa0   :  { %84 = vst.msk [vmem:[#allocation2 - $0x2] sm:$0x30] %vm83_vm6, %v72_v18  ;;  %v113_v19 = vld [vmem:[#allocation2] sm:$0x3] }
  0xa1   :  { %86 = vst.msk [vmem:[#allocation2 - $0x2] sm:$0x30] %vm85_vm7, %v72_v18  ;;  %v138_v20 = vadd.f32 %v136_v16, %v113_v19 }
  0xa2   :  { %88 = vst.msk [vmem:[#allocation2 - $0x2] sm:$0x30] %vm87_vm8, %v72_v18 }
  0xa3   :  { %104 = vst.msk [vmem:[#allocation2 + $0x6] sm:$0x30] %vm83_vm6, %v69_v15  ;;  %v139_v21 = vmul.f32 0.5, %v138_v20 }
  0xa4   :  { %105 = vst.msk [vmem:[#allocation2 + $0x6] sm:$0x30] %vm85_vm7, %v69_v15 }
  0xa5   :  { %106 = vst.msk [vmem:[#allocation2 + $0x6] sm:$0x30] %vm87_vm8, %v69_v15  ;;  %1312 = vtanh.f32 %v139_v21 }
  0xa6   :  { %90 = vst.msk [vmem:[#allocation2 + $0x2] sm:$0xc] %vm89_vm9, %v72_v18 }
  0xa7   :  { %92 = vst.msk [vmem:[#allocation2 + $0x2] sm:$0xc] %vm91_vm10, %v72_v18 }
  0xa8   :  { %94 = vst.msk [vmem:[#allocation2 + $0x2] sm:$0xc] %vm93_vm11, %v72_v18 }
  0xa9   :  { %107 = vst.msk [vmem:[#allocation2 + $0xa] sm:$0xc] %vm89_vm9, %v69_v15  ;;  %v172_v38 = vld [vmem:[#allocation2 + $0x2] sm:$0x3] }
  0xaa   :  { %108 = vst.msk [vmem:[#allocation2 + $0xa] sm:$0xc] %vm91_vm10, %v69_v15 }
  0xab   :  { %109 = vst.msk [vmem:[#allocation2 + $0xa] sm:$0xc] %vm93_vm11, %v69_v15  ;;  %v1313_v22 = vpop.eup %1312 }
  0xac   :  { %98 = vst.msk [vmem:[#allocation2 + $0x6] sm:$0x3] %vm97_vm12, %v72_v18  ;;  %v141_v23 = vmul.f32 0.5, %v1313_v22 }
  0xad   :  { %100 = vst.msk [vmem:[#allocation2 + $0x6] sm:$0x3] %vm99_vm13, %v72_v18 }
  0xae   :  { %111 = vst.msk [vmem:[#allocation2 + $0xe] sm:$0x3] %vm97_vm12, %v69_v15  ;;  %v142_v24 = vadd.f32 0.5, %v141_v23 }
  0xaf   :  { %112 = vst.msk [vmem:[#allocation2 + $0xe] sm:$0x3] %vm99_vm13, %v69_v15  ;;  %v228_v57 = vld [vmem:[#allocation2 + $0x4] sm:$0x3] }
  0xb4   :  { %v284_v14 = vld [vmem:[#allocation2 + $0x6] sm:$0x3] }
 0x101   :  { %v145_v25 = vpop.permute.xlu0 %144 }
 0x102   :  { %v147_v26 = vmul.f32 %v145_v25, %v142_v24 }
 0x104   :  { %149 = vrot.lane.b32.xlu0 %v147_v26, %s1468_s0 }
 0x176   :  { %v150_v27 = vpop.permute.xlu0 %149 }
 0x177   :  { %v152_v28 = vadd.f32 %v150_v27, %v113_v19 }
 0x179   :  { %1314 = vtanh.f32 %v152_v28 }
 0x17f   :  { %v1315_v29 = vpop.eup %1314 }
 0x180   :  { %v154_v30 = vsub.f32 0.0, %v1315_v29 }
 0x182   :  { %156 = vrot.lane.b32.xlu1 %v154_v30, %s1469_s22 }
 0x1f4   :  { %v157_v31 = vpop.permute.xlu1 %156 }
 0x1f5   :  { %v159_v32 = vmul.f32 %v157_v31, %v142_v24 }
 0x1f7   :  { %161 = vrot.lane.b32.xlu1 %v159_v32, %s1470_s23 }
 0x269   :  { %v162_v33 = vpop.permute.xlu1 %161 }
 0x26a   :  { %v164_v34 = vadd.f32 %v1315_v29, %v162_v33  ;;  %v340_v33 = vld [vmem:[#allocation2 + $0x8] sm:$0x3] }
 0x26c   :  { %166 = vrot.lane.b32.xlu2 %v164_v34, %s1468_s0 }
 0x2c6   :  { %v167_v35 = vpop.permute.xlu2 %166 }
 0x2c7   :  { %170 = vst.msk [vmem:[#allocation3] sm:$0x3] %vm169_vm14, %v167_v35  ;;  %1273 = vmatmul.msk.f32.vlgmr.msra.gmra.mxu2 %vm44_vm0, %v167_v35 }
 0x2c8   :  { %171 = vst.msk [vmem:[#allocation3 + $0xe] sm:$0x3] %vm95_vm5, %v167_v35 }
 0x34a   :  { %v192_v36 = vpop.f32.mrf.mxu2 }
 0x34b   :  { %v193_v37 = vadd.f32 %v1506_v12, %v192_v36 }
 0x34d   :  { %201 = vrot.lane.b32.xlu2 %v193_v37, %s1468_s0  ;;  %v195_v39 = vadd.f32 %v193_v37, %v172_v38 }
 0x34f   :  { %v196_v40 = vmul.f32 0.5, %v195_v39 }
 0x351   :  { %1316 = vtanh.f32 %v196_v40 }
 0x357   :  { %v1317_v41 = vpop.eup %1316 }
 0x358   :  { %v198_v42 = vmul.f32 0.5, %v1317_v41 }
 0x35a   :  { %v199_v43 = vadd.f32 0.5, %v198_v42 }
 0x3a7   :  { %v202_v44 = vpop.permute.xlu2 %201 }
 0x3a8   :  { %v204_v45 = vmul.f32 %v202_v44, %v199_v43 }
 0x3aa   :  { %206 = vrot.lane.b32.xlu0 %v204_v45, %s1468_s0 }
 0x41c   :  { %v207_v46 = vpop.permute.xlu0 %206 }
 0x41d   :  { %v209_v47 = vadd.f32 %v207_v46, %v172_v38 }
 0x41f   :  { %1318 = vtanh.f32 %v209_v47 }
 0x425   :  { %v1319_v48 = vpop.eup %1318 }
 0x426   :  { %v211_v49 = vsub.f32 %v164_v34, %v1319_v48 }
 0x428   :  { %213 = vrot.lane.b32.xlu1 %v211_v49, %s1469_s22 }
 0x49a   :  { %v214_v50 = vpop.permute.xlu1 %213 }
 0x49b   :  { %v216_v51 = vmul.f32 %v214_v50, %v199_v43 }
 0x49d   :  { %218 = vrot.lane.b32.xlu2 %v216_v51, %s1470_s23 }
 0x4f7   :  { %v219_v52 = vpop.permute.xlu2 %218 }
 0x4f8   :  { %v221_v53 = vadd.f32 %v1319_v48, %v219_v52  ;;  %v396_v52 = vld [vmem:[#allocation2 + $0xa] sm:$0x3] }
 0x4fa   :  { %223 = vrot.lane.b32.xlu0 %v221_v53, %s1468_s0 }
 0x56c   :  { %v224_v54 = vpop.permute.xlu0 %223 }
 0x56d   :  { %226 = vst.msk [vmem:[#allocation3 + $0x2] sm:$0x3] %vm169_vm14, %v224_v54  ;;  %1274 = vmatmul.msk.f32.vlgmr.msra.gmra.mxu3 %vm44_vm0, %v224_v54 }
 0x56e   :  { %227 = vst.msk [vmem:[#allocation3 + $0xc] sm:$0x3] %vm95_vm5, %v224_v54 }
 0x5f0   :  { %v248_v55 = vpop.f32.mrf.mxu3 }
 0x5f1   :  { %v249_v56 = vadd.f32 %v1506_v12, %v248_v55 }
 0x5f3   :  { %257 = vrot.lane.b32.xlu1 %v249_v56, %s1468_s0  ;;  %v251_v58 = vadd.f32 %v249_v56, %v228_v57 }
 0x5f5   :  { %v252_v59 = vmul.f32 0.5, %v251_v58 }
 0x5f7   :  { %1320 = vtanh.f32 %v252_v59 }
 0x5fd   :  { %v1321_v60 = vpop.eup %1320 }
 0x5fe   :  { %v254_v61 = vmul.f32 0.5, %v1321_v60 }
 0x600   :  { %v255_v62 = vadd.f32 0.5, %v254_v61 }
 0x665   :  { %v258_v63 = vpop.permute.xlu1 %257 }
 0x666   :  { %v260_v0 = vmul.f32 %v258_v63, %v255_v62 }
 0x668   :  { %262 = vrot.lane.b32.xlu2 %v260_v0, %s1468_s0 }
 0x6c2   :  { %v263_v1 = vpop.permute.xlu2 %262 }
 0x6c3   :  { %v265_v2 = vadd.f32 %v263_v1, %v228_v57 }
 0x6c5   :  { %1322 = vtanh.f32 %v265_v2 }
 0x6cb   :  { %v1323_v3 = vpop.eup %1322 }
 0x6cc   :  { %v267_v4 = vsub.f32 %v221_v53, %v1323_v3 }
 0x6ce   :  { %269 = vrot.lane.b32.xlu0 %v267_v4, %s1469_s22 }
 0x740   :  { %v270_v5 = vpop.permute.xlu0 %269 }
 0x741   :  { %v272_v6 = vmul.f32 %v270_v5, %v255_v62 }
 0x743   :  { %274 = vrot.lane.b32.xlu1 %v272_v6, %s1470_s23 }
 0x7b5   :  { %v275_v7 = vpop.permute.xlu1 %274 }
 0x7b6   :  { %v277_v8 = vadd.f32 %v1323_v3, %v275_v7  ;;  %v452_v7 = vld [vmem:[#allocation2 + $0xc] sm:$0x3] }
 0x7b8   :  { %279 = vrot.lane.b32.xlu2 %v277_v8, %s1468_s0 }
 0x812   :  { %v280_v10 = vpop.permute.xlu2 %279 }
 0x813   :  { %282 = vst.msk [vmem:[#allocation3 + $0x4] sm:$0x3] %vm169_vm14, %v280_v10  ;;  %1275 = vmatmul.msk.f32.vlgmr.msrb.gmra.mxu1 %vm44_vm0, %v280_v10 }
 0x814   :  { %283 = vst.msk [vmem:[#allocation3 + $0xa] sm:$0x3] %vm95_vm5, %v280_v10 }
 0x890   :  { %v304_v11 = vpop.f32.mrf.mxu1 }
 0x891   :  { %v305_v13 = vadd.f32 %v1506_v12, %v304_v11 }
 0x893   :  { %313 = vrot.lane.b32.xlu0 %v305_v13, %s1468_s0  ;;  %v307_v15 = vadd.f32 %v305_v13, %v284_v14 }
 0x895   :  { %v308_v16 = vmul.f32 0.5, %v307_v15 }
 0x897   :  { %1324 = vtanh.f32 %v308_v16 }
 0x89d   :  { %v1325_v17 = vpop.eup %1324 }
 0x89e   :  { %v310_v18 = vmul.f32 0.5, %v1325_v17 }
 0x8a0   :  { %v311_v19 = vadd.f32 0.5, %v310_v18 }
 0x905   :  { %v314_v20 = vpop.permute.xlu0 %313 }
 0x906   :  { %v316_v21 = vmul.f32 %v314_v20, %v311_v19 }
 0x908   :  { %318 = vrot.lane.b32.xlu1 %v316_v21, %s1468_s0 }
 0x97a   :  { %v319_v22 = vpop.permute.xlu1 %318 }
 0x97b   :  { %v321_v23 = vadd.f32 %v319_v22, %v284_v14 }
 0x97d   :  { %1326 = vtanh.f32 %v321_v23 }
 0x983   :  { %v1327_v24 = vpop.eup %1326 }
 0x984   :  { %v323_v25 = vsub.f32 %v277_v8, %v1327_v24 }
 0x986   :  { %325 = vrot.lane.b32.xlu2 %v323_v25, %s1469_s22 }
 0x9e0   :  { %v326_v26 = vpop.permute.xlu2 %325 }
 0x9e1   :  { %v328_v27 = vmul.f32 %v326_v26, %v311_v19 }
 0x9e3   :  { %330 = vrot.lane.b32.xlu0 %v328_v27, %s1470_s23 }
 0xa55   :  { %v331_v28 = vpop.permute.xlu0 %330 }
 0xa56   :  { %v333_v29 = vadd.f32 %v1327_v24, %v331_v28  ;;  %v508_v28 = vld [vmem:[#allocation2 + $0xe] sm:$0x3] }
 0xa58   :  { %335 = vrot.lane.b32.xlu1 %v333_v29, %s1468_s0 }
 0xaca   :  { %v336_v30 = vpop.permute.xlu1 %335 }
 0xacb   :  { %338 = vst.msk [vmem:[#allocation3 + $0x6] sm:$0x3] %vm169_vm14, %v336_v30  ;;  %1276 = vmatmul.msk.f32.vlgmr.msrb.gmra.mxu2 %vm44_vm0, %v336_v30 }
 0xacc   :  { %339 = vst.msk [vmem:[#allocation3 + $0x8] sm:$0x3] %vm95_vm5, %v336_v30 }
 0xb4e   :  { %v360_v31 = vpop.f32.mrf.mxu2 }
 0xb4f   :  { %v361_v32 = vadd.f32 %v1506_v12, %v360_v31 }
 0xb51   :  { %369 = vrot.lane.b32.xlu2 %v361_v32, %s1468_s0  ;;  %v363_v34 = vadd.f32 %v361_v32, %v340_v33 }
 0xb53   :  { %v364_v35 = vmul.f32 0.5, %v363_v34 }
 0xb55   :  { %1328 = vtanh.f32 %v364_v35 }
 0xb5b   :  { %v1329_v36 = vpop.eup %1328 }
 0xb5c   :  { %v366_v37 = vmul.f32 0.5, %v1329_v36 }
 0xb5e   :  { %v367_v38 = vadd.f32 0.5, %v366_v37 }
 0xbab   :  { %v370_v39 = vpop.permute.xlu2 %369 }
 0xbac   :  { %v372_v40 = vmul.f32 %v370_v39, %v367_v38 }
 0xbae   :  { %374 = vrot.lane.b32.xlu0 %v372_v40, %s1468_s0 }
 0xc20   :  { %v375_v41 = vpop.permute.xlu0 %374 }
 0xc21   :  { %v377_v42 = vadd.f32 %v375_v41, %v340_v33  ;;  %v574_v41 = vld [vmem:[#allocation4 + $0x90] sm:$0xff] }
 0xc22   :  { %646 = vmatpush.msra.mxu3 %v574_v41  ;;  %702 = vmatpush.msra.mxu0 %v574_v41 }
 0xc23   :  { %1330 = vtanh.f32 %v377_v42  ;;  %v573_v42 = vld [vmem:[#allocation4 + $0x88] sm:$0xff]  ;;  %758 = vmatpush.msrb.mxu1 %v574_v41 }
 0xc24   :  { %647 = vmatpush.msra.mxu3 %v573_v42  ;;  %703 = vmatpush.msra.mxu0 %v573_v42 }
 0xc25   :  { %759 = vmatpush.msrb.mxu1 %v573_v42 }
 0xc29   :  { %v1331_v43 = vpop.eup %1330 }
 0xc2a   :  { %v379_v44 = vsub.f32 %v333_v29, %v1331_v43 }
 0xc2c   :  { %381 = vrot.lane.b32.xlu1 %v379_v44, %s1469_s22  ;;  %v571_v44 = vld [vmem:[#allocation4 + $0x78] sm:$0xff] }
 0xc9e   :  { %v382_v45 = vpop.permute.xlu1 %381 }
 0xc9f   :  { %v384_v46 = vmul.f32 %v382_v45, %v367_v38 }
 0xca1   :  { %386 = vrot.lane.b32.xlu2 %v384_v46, %s1470_s23 }
 0xcfb   :  { %v387_v47 = vpop.permute.xlu2 %386 }
 0xcfc   :  { %v389_v48 = vadd.f32 %v1331_v43, %v387_v47  ;;  %v572_v43 = vld [vmem:[#allocation4 + $0x80] sm:$0xff] }
 0xcfd   :  { %648 = vmatpush.msra.mxu3 %v572_v43  ;;  %704 = vmatpush.msra.mxu0 %v572_v43  ;;  %v568_v47 = vld [vmem:[#allocation4 + $0x60] sm:$0xff] }
 0xcfe   :  { %391 = vrot.lane.b32.xlu0 %v389_v48, %s1468_s0  ;;  %760 = vmatpush.msrb.mxu1 %v572_v43 }
 0xcff   :  { %649 = vmatpush.msra.mxu3 %v571_v44  ;;  %705 = vmatpush.msra.mxu0 %v571_v44 }
 0xd00   :  { %761 = vmatpush.msrb.mxu1 %v571_v44 }
 0xd70   :  { %v392_v49 = vpop.permute.xlu0 %391 }
 0xd71   :  { %394 = vst.msk [vmem:[#allocation3 + $0x8] sm:$0x3] %vm169_vm14, %v392_v49  ;;  %1277 = vmatmul.msk.f32.vlgmr.msrb.gmra.mxu3 %vm44_vm0, %v392_v49 }
 0xd72   :  { %395 = vst.msk [vmem:[#allocation3 + $0x6] sm:$0x3] %vm95_vm5, %v392_v49  ;;  %814 = vmatpush.msrb.mxu3 %v574_v41  ;;  %v566_v49 = vld [vmem:[#allocation4 + $0x50] sm:$0xff] }
 0xd74   :  { %815 = vmatpush.msrb.mxu3 %v573_v42 }
 0xd76   :  { %816 = vmatpush.msrb.mxu3 %v572_v43 }
 0xd78   :  { %817 = vmatpush.msrb.mxu3 %v571_v44 }
 0xd79   :  { %650 = vmatmul.f32.vlgmr.msra.gmra.mxu3 %v1467_v9  ;;  %v569_v9 = vld [vmem:[#allocation4 + $0x68] sm:$0xff] }
 0xd7a   :  { %1038 = vmatpush.msra.mxu3 %v574_v41  ;;  %595 = vmatpush.msra.mxu2 %v569_v9 }
 0xd7c   :  { %1039 = vmatpush.msra.mxu3 %v573_v42  ;;  %596 = vmatpush.msra.mxu2 %v568_v47 }
 0xd7e   :  { %1040 = vmatpush.msra.mxu3 %v572_v43 }
 0xd80   :  { %1041 = vmatpush.msra.mxu3 %v571_v44 }
 0xdf4   :  { %v416_v50 = vpop.f32.mrf.mxu3 }
 0xdf5   :  { %v417_v51 = vadd.f32 %v1506_v12, %v416_v50  ;;  %v1604_v50 = vld [vmem:[#allocation4 + $0x98] ss:$0 sm:$0xff] }
 0xdf7   :  { %425 = vrot.lane.b32.xlu1 %v417_v51, %s1468_s0  ;;  %v419_v53 = vadd.f32 %v417_v51, %v396_v52 }
 0xdf9   :  { %v420_v54 = vmul.f32 0.5, %v419_v53 }
 0xdfb   :  { %1332 = vtanh.f32 %v420_v54 }
 0xdfc   :  { %v651_v51 = vpop.f32.mrf.mxu3 }
 0xe01   :  { %v1333_v55 = vpop.eup %1332 }
 0xe02   :  { %v422_v56 = vmul.f32 0.5, %v1333_v55 }
 0xe04   :  { %v423_v57 = vadd.f32 0.5, %v422_v56  ;;  %v1310_v56 = vld [vmem:[#allocation4 + $0x70] ss:$0 sm:$0xff] }
 0xe69   :  { %v426_v58 = vpop.permute.xlu1 %425 }
 0xe6a   :  { %v428_v59 = vmul.f32 %v426_v58, %v423_v57 }
 0xe6c   :  { %430 = vrot.lane.b32.xlu2 %v428_v59, %s1468_s0 }
 0xec6   :  { %v431_v60 = vpop.permute.xlu2 %430 }
 0xec7   :  { %v433_v61 = vadd.f32 %v431_v60, %v396_v52  ;;  %v652_v52 = vadd.f32 %v1604_v50, %v651_v51 }
 0xec9   :  { %1334 = vtanh.f32 %v433_v61 }
 0xecf   :  { %v1335_v62 = vpop.eup %1334 }
 0xed0   :  { %v435_v63 = vsub.f32 %v389_v48, %v1335_v62  ;;  %v567_v48 = vld [vmem:[#allocation4 + $0x58] sm:$0xff] }
 0xed1   :  { %597 = vmatpush.msra.mxu2 %v567_v48 }
 0xed2   :  { %437 = vrot.lane.b32.xlu0 %v435_v63, %s1469_s22 }
 0xed3   :  { %598 = vmatpush.msra.mxu2 %v566_v49 }
 0xed5   :  { %982 = vmatpush.msrb.mxu2 %v574_v41 }
 0xed7   :  { %983 = vmatpush.msrb.mxu2 %v573_v42 }
 0xed9   :  { %984 = vmatpush.msrb.mxu2 %v572_v43 }
 0xedb   :  { %985 = vmatpush.msrb.mxu2 %v571_v44 }
 0xf44   :  { %v438_v0 = vpop.permute.xlu0 %437 }
 0xf45   :  { %v440_v1 = vmul.f32 %v438_v0, %v423_v57 }
 0xf47   :  { %442 = vrot.lane.b32.xlu1 %v440_v1, %s1470_s23 }
 0xfb9   :  { %v443_v2 = vpop.permute.xlu1 %442 }
 0xfba   :  { %v445_v3 = vadd.f32 %v1335_v62, %v443_v2 }
 0xfbc   :  { %447 = vrot.lane.b32.xlu2 %v445_v3, %s1468_s0 }
0x1016   :  { %v448_v4 = vpop.permute.xlu2 %447 }
0x1017   :  { %450 = vst.msk [vmem:[#allocation3 + $0xa] sm:$0x3] %vm169_vm14, %v448_v4  ;;  %1278 = vmatmul.msk.f32.vlgmr.msrb.gmra.mxu0 %vm44_vm0, %v448_v4 }
0x1018   :  { %451 = vst.msk [vmem:[#allocation3 + $0x4] sm:$0x3] %vm95_vm5, %v448_v4  ;;  %870 = vmatpush.msrb.mxu0 %v574_v41 }
0x101a   :  { %871 = vmatpush.msrb.mxu0 %v573_v42 }
0x101c   :  { %872 = vmatpush.msrb.mxu0 %v572_v43 }
0x101e   :  { %873 = vmatpush.msrb.mxu0 %v571_v44 }
0x1094   :  { %v472_v5 = vpop.f32.mrf.mxu0 }
0x1095   :  { %v473_v6 = vadd.f32 %v1506_v12, %v472_v5 }
0x1097   :  { %481 = vrot.lane.b32.xlu0 %v473_v6, %s1468_s0  ;;  %v475_v8 = vadd.f32 %v473_v6, %v452_v7 }
0x1099   :  { %v476_v10 = vmul.f32 0.5, %v475_v8 }
0x109b   :  { %1336 = vtanh.f32 %v476_v10 }
0x10a1   :  { %v1337_v11 = vpop.eup %1336 }
0x10a2   :  { %v478_v13 = vmul.f32 0.5, %v1337_v11 }
0x10a4   :  { %v479_v14 = vadd.f32 0.5, %v478_v13 }
0x1109   :  { %v482_v15 = vpop.permute.xlu0 %481 }
0x110a   :  { %v484_v16 = vmul.f32 %v482_v15, %v479_v14 }
0x110c   :  { %486 = vrot.lane.b32.xlu1 %v484_v16, %s1468_s0 }
0x117e   :  { %v487_v17 = vpop.permute.xlu1 %486 }
0x117f   :  { %v489_v18 = vadd.f32 %v487_v17, %v452_v7 }
0x1181   :  { %1338 = vtanh.f32 %v489_v18 }
0x1187   :  { %v1339_v19 = vpop.eup %1338 }
0x1188   :  { %v491_v20 = vsub.f32 %v445_v3, %v1339_v19 }
0x118a   :  { %493 = vrot.lane.b32.xlu2 %v491_v20, %s1469_s22 }
0x11e4   :  { %v494_v21 = vpop.permute.xlu2 %493 }
0x11e5   :  { %v496_v22 = vmul.f32 %v494_v21, %v479_v14 }
0x11e7   :  { %498 = vrot.lane.b32.xlu0 %v496_v22, %s1470_s23 }
0x1259   :  { %v499_v23 = vpop.permute.xlu0 %498 }
0x125a   :  { %v501_v24 = vadd.f32 %v1339_v19, %v499_v23 }
0x125c   :  { %503 = vrot.lane.b32.xlu1 %v501_v24, %s1468_s0 }
0x12ce   :  { %v504_v25 = vpop.permute.xlu1 %503 }
0x12cf   :  { %506 = vst.msk [vmem:[#allocation3 + $0xc] sm:$0x3] %vm169_vm14, %v504_v25  ;;  %1279 = vmatmul.msk.f32.vlgmr.msra.gmra.mxu1 %vm44_vm0, %v504_v25 }
0x12d0   :  { %507 = vst.msk [vmem:[#allocation3 + $0x2] sm:$0x3] %vm95_vm5, %v504_v25  ;;  %926 = vmatpush.msra.mxu1 %v574_v41 }
0x12d2   :  { %927 = vmatpush.msra.mxu1 %v573_v42 }
0x12d4   :  { %928 = vmatpush.msra.mxu1 %v572_v43 }
0x12d6   :  { %929 = vmatpush.msra.mxu1 %v571_v44 }
0x134c   :  { %v528_v26 = vpop.f32.mrf.mxu1 }
0x134d   :  { %v529_v27 = vadd.f32 %v1506_v12, %v528_v26 }
0x134f   :  { %537 = vrot.lane.b32.xlu2 %v529_v27, %s1468_s0  ;;  %v531_v29 = vadd.f32 %v529_v27, %v508_v28 }
0x1351   :  { %v532_v30 = vmul.f32 0.5, %v531_v29 }
0x1353   :  { %1340 = vtanh.f32 %v532_v30 }
0x1359   :  { %v1341_v31 = vpop.eup %1340 }
0x135a   :  { %v534_v32 = vmul.f32 0.5, %v1341_v31 }
0x135c   :  { %v535_v33 = vadd.f32 0.5, %v534_v32 }
0x13a9   :  { %v538_v34 = vpop.permute.xlu2 %537 }
0x13aa   :  { %v540_v35 = vmul.f32 %v538_v34, %v535_v33 }
0x13ac   :  { %542 = vrot.lane.b32.xlu0 %v540_v35, %s1468_s0 }
0x141e   :  { %v543_v36 = vpop.permute.xlu0 %542 }
0x141f   :  { %v545_v37 = vadd.f32 %v543_v36, %v508_v28 }
0x1421   :  { %1342 = vtanh.f32 %v545_v37 }
0x1427   :  { %v1343_v38 = vpop.eup %1342 }
0x1428   :  { %v547_v39 = vsub.f32 %v501_v24, %v1343_v38 }
0x142a   :  { %549 = vrot.lane.b32.xlu1 %v547_v39, %s1469_s22 }
0x1432   :  { %660 = vrot.lane.b32.xlu1 %v652_v52, %s1468_s0 }
0x149c   :  { %v550_v12 = vpop.permute.xlu1 %549 }
0x149d   :  { %v552_v40 = vmul.f32 %v550_v12, %v535_v33 }
0x149f   :  { %554 = vrot.lane.b32.xlu2 %v552_v40, %s1470_s23 }
0x14a4   :  { %v661_v2 = vpop.permute.xlu1 %660 }
0x14f9   :  { %v555_v45 = vpop.permute.xlu2 %554 }
0x14fa   :  { %v557_v46 = vadd.f32 %v1343_v38, %v555_v45 }
0x14fc   :  { %559 = vrot.lane.b32.xlu0 %v557_v46, %s1468_s0 }
0x156e   :  { %v560_v53 = vpop.permute.xlu0 %559 }
0x156f   :  { %562 = vst.msk [vmem:[#allocation3 + $0xe] sm:$0x3] %vm169_vm14, %v560_v53 }
0x1570   :  { %563 = vst.msk [vmem:[#allocation3] sm:$0x3] %vm95_vm5, %v560_v53 }
0x1576   :  { %v565_v55 = vld [vmem:[#allocation3 + $0x8] sm:$0xff] }
0x1577   :  { %v564_v54 = vld [vmem:[#allocation3] sm:$0xff] }
0x1578   :  { %1280 = vmatmul.msk.f32.vlgmr.msra.gmra.mxu2 %vm44_vm0, %v564_v54 }
0x1580   :  { %1281 = vmatmul.msk.f32.gmra.mxu2 %vm44_vm0, %v565_v55 }
0x15fb   :  { %v600_v57 = vpop.f32.mrf.mxu2 }
0x15fc   :  { %v601_v58 = vadd.f32 %v1310_v56, %v600_v57 }
0x15fe   :  { %606 = vst.msk [vmem:[#allocation2] sm:$0xff] %vm74_vm1, %v601_v58 }
0x1603   :  { %v603_v59 = vpop.f32.mrf.mxu2 }
0x1604   :  { %v604_v60 = vadd.f32 %v1310_v56, %v603_v59 }
0x1606   :  { %607 = vst.msk [vmem:[#allocation2 + $0x8] sm:$0xff] %vm74_vm1, %v604_v60  ;;  %vm1206_vm1 = vcmask 58368  }
0x1607   :  { %608 = vst.msk [vmem:[#allocation2 - $0x6] sm:$0xc0] %vm77_vm2, %v604_v60 }
0x1608   :  { %611 = vst.msk [vmem:[#allocation2 - $0x2] sm:$0x30] %vm83_vm6, %v604_v60 }
0x1609   :  { %614 = vst.msk [vmem:[#allocation2 + $0x2] sm:$0xc] %vm89_vm9, %v604_v60 }
0x160a   :  { %617 = vst.msk [vmem:[#allocation2 + $0x6] sm:$0x3] %vm95_vm5, %v604_v60 }
0x160b   :  { %609 = vst.msk [vmem:[#allocation2 - $0x6] sm:$0xc0] %vm79_vm3, %v604_v60 }
0x160c   :  { %610 = vst.msk [vmem:[#allocation2 - $0x6] sm:$0xc0] %vm81_vm4, %v604_v60 }
0x160d   :  { %612 = vst.msk [vmem:[#allocation2 - $0x2] sm:$0x30] %vm85_vm7, %v604_v60 }
0x160e   :  { %615 = vst.msk [vmem:[#allocation2 + $0x2] sm:$0xc] %vm91_vm10, %v604_v60 }
0x160f   :  { %618 = vst.msk [vmem:[#allocation2 + $0x6] sm:$0x3] %vm97_vm12, %v604_v60 }
0x1610   :  { %620 = vst.msk [vmem:[#allocation2 + $0x2] sm:$0xc0] %vm77_vm2, %v601_v58  ;;  %vm1236_vm2 = vcmask 254976  }
0x1611   :  { %623 = vst.msk [vmem:[#allocation2 + $0x6] sm:$0x30] %vm83_vm6, %v601_v58 }
0x1612   :  { %626 = vst.msk [vmem:[#allocation2 + $0xa] sm:$0xc] %vm89_vm9, %v601_v58 }
0x1613   :  { %v632_v61 = vld [vmem:[#allocation2] sm:$0x3]  ;;  %629 = vst.msk [vmem:[#allocation2 + $0xe] sm:$0x3] %vm95_vm5, %v601_v58 }
0x1614   :  { %v654_v62 = vadd.f32 %v652_v52, %v632_v61  ;;  %613 = vst.msk [vmem:[#allocation2 - $0x2] sm:$0x30] %vm87_vm8, %v604_v60 }
0x1615   :  { %616 = vst.msk [vmem:[#allocation2 + $0x2] sm:$0xc] %vm93_vm11, %v604_v60 }
0x1616   :  { %v655_v63 = vmul.f32 0.5, %v654_v62  ;;  %619 = vst.msk [vmem:[#allocation2 + $0x6] sm:$0x3] %vm99_vm13, %v604_v60 }
0x1617   :  { %621 = vst.msk [vmem:[#allocation2 + $0x2] sm:$0xc0] %vm79_vm3, %v601_v58 }
0x1618   :  { %1344 = vtanh.f32 %v655_v63  ;;  %624 = vst.msk [vmem:[#allocation2 + $0x6] sm:$0x30] %vm85_vm7, %v601_v58 }
0x1619   :  { %627 = vst.msk [vmem:[#allocation2 + $0xa] sm:$0xc] %vm91_vm10, %v601_v58 }
0x161a   :  { %630 = vst.msk [vmem:[#allocation2 + $0xe] sm:$0x3] %vm97_vm12, %v601_v58 }
0x161b   :  { %622 = vst.msk [vmem:[#allocation2 + $0x2] sm:$0xc0] %vm81_vm4, %v601_v58  ;;  %v687_v18 = vld [vmem:[#allocation2 + $0x2] sm:$0x3] }
0x161c   :  { %625 = vst.msk [vmem:[#allocation2 + $0x6] sm:$0x30] %vm87_vm8, %v601_v58  ;;  %v743_v37 = vld [vmem:[#allocation2 + $0x4] sm:$0x3] }
0x161d   :  { %628 = vst.msk [vmem:[#allocation2 + $0xa] sm:$0xc] %vm93_vm11, %v601_v58  ;;  %v799_v55 = vld [vmem:[#allocation2 + $0x6] sm:$0x3] }
0x161e   :  { %v1345_v0 = vpop.eup %1344  ;;  %631 = vst.msk [vmem:[#allocation2 + $0xe] sm:$0x3] %vm99_vm13, %v601_v58 }
0x161f   :  { %v657_v1 = vmul.f32 0.5, %v1345_v0 }
0x1621   :  { %v658_v3 = vadd.f32 0.5, %v657_v1 }
0x1623   :  { %v663_v4 = vmul.f32 %v661_v2, %v658_v3 }
0x1625   :  { %665 = vrot.lane.b32.xlu2 %v663_v4, %s1468_s0 }
0x167f   :  { %v666_v5 = vpop.permute.xlu2 %665 }
0x1680   :  { %v668_v6 = vadd.f32 %v666_v5, %v632_v61 }
0x1682   :  { %1346 = vtanh.f32 %v668_v6 }
0x1688   :  { %v1347_v7 = vpop.eup %1346 }
0x1689   :  { %v670_v8 = vsub.f32 0.0, %v1347_v7 }
0x168b   :  { %672 = vrot.lane.b32.xlu0 %v670_v8, %s1469_s22 }
0x16fd   :  { %v673_v10 = vpop.permute.xlu0 %672 }
0x16fe   :  { %v675_v11 = vmul.f32 %v673_v10, %v658_v3 }
0x1700   :  { %677 = vrot.lane.b32.xlu1 %v675_v11, %s1470_s23  ;;  %v855_v11 = vld [vmem:[#allocation2 + $0x8] sm:$0x3] }
0x1772   :  { %v678_v13 = vpop.permute.xlu1 %677 }
0x1773   :  { %v680_v14 = vadd.f32 %v1347_v7, %v678_v13 }
0x1775   :  { %682 = vrot.lane.b32.xlu2 %v680_v14, %s1468_s0 }
0x17cf   :  { %v683_v15 = vpop.permute.xlu2 %682 }
0x17d0   :  { %685 = vst.msk [vmem:[#allocation3] sm:$0x3] %vm169_vm14, %v683_v15  ;;  %1282 = vmatmul.msk.f32.vlgmr.msra.gmra.mxu0 %vm44_vm0, %v683_v15 }
0x17d1   :  { %686 = vst.msk [vmem:[#allocation3 + $0xe] sm:$0x3] %vm95_vm5, %v683_v15 }
0x184d   :  { %v707_v16 = vpop.f32.mrf.mxu0 }
0x184e   :  { %v708_v17 = vadd.f32 %v1604_v50, %v707_v16 }
0x1850   :  { %716 = vrot.lane.b32.xlu0 %v708_v17, %s1468_s0  ;;  %v710_v19 = vadd.f32 %v708_v17, %v687_v18 }
0x1852   :  { %v711_v20 = vmul.f32 0.5, %v710_v19 }
0x1854   :  { %1348 = vtanh.f32 %v711_v20 }
0x185a   :  { %v1349_v21 = vpop.eup %1348 }
0x185b   :  { %v713_v22 = vmul.f32 0.5, %v1349_v21 }
0x185d   :  { %v714_v23 = vadd.f32 0.5, %v713_v22 }
0x18c2   :  { %v717_v24 = vpop.permute.xlu0 %716 }
0x18c3   :  { %v719_v25 = vmul.f32 %v717_v24, %v714_v23 }
0x18c5   :  { %721 = vrot.lane.b32.xlu1 %v719_v25, %s1468_s0 }
0x1937   :  { %v722_v26 = vpop.permute.xlu1 %721 }
0x1938   :  { %v724_v27 = vadd.f32 %v722_v26, %v687_v18 }
0x193a   :  { %1350 = vtanh.f32 %v724_v27 }
0x1940   :  { %v1351_v28 = vpop.eup %1350 }
0x1941   :  { %v726_v29 = vsub.f32 %v680_v14, %v1351_v28 }
0x1943   :  { %728 = vrot.lane.b32.xlu2 %v726_v29, %s1469_s22 }
0x199d   :  { %v729_v30 = vpop.permute.xlu2 %728 }
0x199e   :  { %v731_v31 = vmul.f32 %v729_v30, %v714_v23 }
0x19a0   :  { %733 = vrot.lane.b32.xlu0 %v731_v31, %s1470_s23  ;;  %v911_v31 = vld [vmem:[#allocation2 + $0xa] sm:$0x3] }
0x1a12   :  { %v734_v32 = vpop.permute.xlu0 %733 }
0x1a13   :  { %v736_v33 = vadd.f32 %v1351_v28, %v734_v32 }
0x1a15   :  { %738 = vrot.lane.b32.xlu1 %v736_v33, %s1468_s0 }
0x1a87   :  { %v739_v34 = vpop.permute.xlu1 %738 }
0x1a88   :  { %741 = vst.msk [vmem:[#allocation3 + $0x2] sm:$0x3] %vm169_vm14, %v739_v34  ;;  %1283 = vmatmul.msk.f32.vlgmr.msrb.gmra.mxu1 %vm44_vm0, %v739_v34 }
0x1a89   :  { %742 = vst.msk [vmem:[#allocation3 + $0xc] sm:$0x3] %vm95_vm5, %v739_v34 }
0x1b05   :  { %v763_v35 = vpop.f32.mrf.mxu1 }
0x1b06   :  { %v764_v36 = vadd.f32 %v1604_v50, %v763_v35 }
0x1b08   :  { %772 = vrot.lane.b32.xlu2 %v764_v36, %s1468_s0  ;;  %v766_v38 = vadd.f32 %v764_v36, %v743_v37 }
0x1b0a   :  { %v767_v39 = vmul.f32 0.5, %v766_v38 }
0x1b0c   :  { %1352 = vtanh.f32 %v767_v39 }
0x1b12   :  { %v1353_v12 = vpop.eup %1352 }
0x1b13   :  { %v769_v40 = vmul.f32 0.5, %v1353_v12 }
0x1b15   :  { %v770_v41 = vadd.f32 0.5, %v769_v40 }
0x1b62   :  { %v773_v42 = vpop.permute.xlu2 %772 }
0x1b63   :  { %v775_v43 = vmul.f32 %v773_v42, %v770_v41 }
0x1b65   :  { %777 = vrot.lane.b32.xlu0 %v775_v43, %s1468_s0 }
0x1bd7   :  { %v778_v44 = vpop.permute.xlu0 %777 }
0x1bd8   :  { %v780_v45 = vadd.f32 %v778_v44, %v743_v37 }
0x1bda   :  { %1354 = vtanh.f32 %v780_v45 }
0x1be0   :  { %v1355_v46 = vpop.eup %1354 }
0x1be1   :  { %v782_v9 = vsub.f32 %v736_v33, %v1355_v46 }
0x1be3   :  { %784 = vrot.lane.b32.xlu1 %v782_v9, %s1469_s22 }
0x1c55   :  { %v785_v47 = vpop.permute.xlu1 %784 }
0x1c56   :  { %v787_v48 = vmul.f32 %v785_v47, %v770_v41 }
0x1c58   :  { %789 = vrot.lane.b32.xlu2 %v787_v48, %s1470_s23  ;;  %v967_v48 = vld [vmem:[#allocation2 + $0xc] sm:$0x3] }
0x1cb2   :  { %v790_v49 = vpop.permute.xlu2 %789 }
0x1cb3   :  { %v792_v51 = vadd.f32 %v1355_v46, %v790_v49 }
0x1cb5   :  { %794 = vrot.lane.b32.xlu0 %v792_v51, %s1468_s0 }
0x1d27   :  { %v795_v52 = vpop.permute.xlu0 %794 }
0x1d28   :  { %797 = vst.msk [vmem:[#allocation3 + $0x4] sm:$0x3] %vm169_vm14, %v795_v52  ;;  %1284 = vmatmul.msk.f32.vlgmr.msrb.gmra.mxu3 %vm44_vm0, %v795_v52 }
0x1d29   :  { %798 = vst.msk [vmem:[#allocation3 + $0xa] sm:$0x3] %vm95_vm5, %v795_v52 }
0x1dab   :  { %v819_v53 = vpop.f32.mrf.mxu3 }
0x1dac   :  { %v820_v54 = vadd.f32 %v1604_v50, %v819_v53 }
0x1dae   :  { %828 = vrot.lane.b32.xlu1 %v820_v54, %s1468_s0  ;;  %v822_v56 = vadd.f32 %v820_v54, %v799_v55 }
0x1db0   :  { %v823_v57 = vmul.f32 0.5, %v822_v56 }
0x1db2   :  { %1356 = vtanh.f32 %v823_v57 }
0x1db8   :  { %v1357_v58 = vpop.eup %1356 }
0x1db9   :  { %v825_v59 = vmul.f32 0.5, %v1357_v58 }
0x1dbb   :  { %v826_v60 = vadd.f32 0.5, %v825_v59 }
0x1e20   :  { %v829_v61 = vpop.permute.xlu1 %828 }
0x1e21   :  { %v831_v62 = vmul.f32 %v829_v61, %v826_v60 }
0x1e23   :  { %833 = vrot.lane.b32.xlu2 %v831_v62, %s1468_s0 }
0x1e7d   :  { %v834_v63 = vpop.permute.xlu2 %833 }
0x1e7e   :  { %v836_v0 = vadd.f32 %v834_v63, %v799_v55 }
0x1e80   :  { %1358 = vtanh.f32 %v836_v0 }
0x1e86   :  { %v1359_v1 = vpop.eup %1358 }
0x1e87   :  { %v838_v2 = vsub.f32 %v792_v51, %v1359_v1 }
0x1e89   :  { %840 = vrot.lane.b32.xlu0 %v838_v2, %s1469_s22 }
0x1efb   :  { %v841_v3 = vpop.permute.xlu0 %840 }
0x1efc   :  { %v843_v4 = vmul.f32 %v841_v3, %v826_v60 }
0x1efe   :  { %845 = vrot.lane.b32.xlu1 %v843_v4, %s1470_s23  ;;  %v1023_v4 = vld [vmem:[#allocation2 + $0xe] sm:$0x3] }
0x1f70   :  { %v846_v5 = vpop.permute.xlu1 %845 }
0x1f71   :  { %v848_v6 = vadd.f32 %v1359_v1, %v846_v5 }
0x1f73   :  { %850 = vrot.lane.b32.xlu2 %v848_v6, %s1468_s0 }
0x1fcd   :  { %v851_v7 = vpop.permute.xlu2 %850 }
0x1fce   :  { %853 = vst.msk [vmem:[#allocation3 + $0x6] sm:$0x3] %vm169_vm14, %v851_v7  ;;  %1285 = vmatmul.msk.f32.vlgmr.msrb.gmra.mxu0 %vm44_vm0, %v851_v7 }
0x1fcf   :  { %854 = vst.msk [vmem:[#allocation3 + $0x8] sm:$0x3] %vm95_vm5, %v851_v7 }
0x204b   :  { %v875_v8 = vpop.f32.mrf.mxu0 }
0x204c   :  { %v876_v10 = vadd.f32 %v1604_v50, %v875_v8 }
0x204e   :  { %884 = vrot.lane.b32.xlu0 %v876_v10, %s1468_s0  ;;  %v878_v13 = vadd.f32 %v876_v10, %v855_v11 }
0x2050   :  { %v879_v14 = vmul.f32 0.5, %v878_v13 }
0x2052   :  { %1360 = vtanh.f32 %v879_v14 }
0x2058   :  { %v1361_v15 = vpop.eup %1360 }
0x2059   :  { %v881_v16 = vmul.f32 0.5, %v1361_v15 }
0x205b   :  { %v882_v17 = vadd.f32 0.5, %v881_v16 }
0x20c0   :  { %v885_v18 = vpop.permute.xlu0 %884 }
0x20c1   :  { %v887_v19 = vmul.f32 %v885_v18, %v882_v17 }
0x20c3   :  { %889 = vrot.lane.b32.xlu1 %v887_v19, %s1468_s0 }
0x2135   :  { %v890_v20 = vpop.permute.xlu1 %889 }
0x2136   :  { %v892_v21 = vadd.f32 %v890_v20, %v855_v11 }
0x2138   :  { %1362 = vtanh.f32 %v892_v21  ;;  %v1084_v21 = vld [vmem:[#allocation4 + $0xb8] sm:$0xff] }
0x2139   :  { %1112 = vmatpush.msra.mxu0 %v1084_v21 }
0x213e   :  { %v1363_v22 = vpop.eup %1362 }
0x213f   :  { %v894_v23 = vsub.f32 %v848_v6, %v1363_v22 }
0x2141   :  { %896 = vrot.lane.b32.xlu2 %v894_v23, %s1469_s22  ;;  %v1082_v23 = vld [vmem:[#allocation4 + $0xa8] sm:$0xff] }
0x219b   :  { %v897_v24 = vpop.permute.xlu2 %896 }
0x219c   :  { %v899_v25 = vmul.f32 %v897_v24, %v882_v17  ;;  %v1081_v24 = vld [vmem:[#allocation4 + $0xa0] sm:$0xff] }
0x219e   :  { %901 = vrot.lane.b32.xlu0 %v899_v25, %s1470_s23 }
0x2210   :  { %v902_v26 = vpop.permute.xlu0 %901 }
0x2211   :  { %v904_v27 = vadd.f32 %v1363_v22, %v902_v26  ;;  %v1083_v22 = vld [vmem:[#allocation4 + $0xb0] sm:$0xff] }
0x2212   :  { %1113 = vmatpush.msra.mxu0 %v1083_v22 }
0x2213   :  { %906 = vrot.lane.b32.xlu1 %v904_v27, %s1468_s0 }
0x2214   :  { %1114 = vmatpush.msra.mxu0 %v1082_v23 }
0x2216   :  { %1115 = vmatpush.msra.mxu0 %v1081_v24 }
0x2285   :  { %v907_v28 = vpop.permute.xlu1 %906 }
0x2286   :  { %909 = vst.msk [vmem:[#allocation3 + $0x8] sm:$0x3] %vm169_vm14, %v907_v28  ;;  %1286 = vmatmul.msk.f32.vlgmr.msra.gmra.mxu1 %vm44_vm0, %v907_v28 }
0x2287   :  { %910 = vst.msk [vmem:[#allocation3 + $0x6] sm:$0x3] %vm95_vm5, %v907_v28  ;;  %v1089_v28 = vld [vmem:[#allocation4 + $0xe0] sm:$0xff] }
0x2288   :  { %1143 = vmatpush.msrb.mxu1 %v1089_v28 }
0x2303   :  { %v931_v29 = vpop.f32.mrf.mxu1 }
0x2304   :  { %v932_v30 = vadd.f32 %v1604_v50, %v931_v29  ;;  %v1088_v29 = vld [vmem:[#allocation4 + $0xd8] sm:$0xff] }
0x2305   :  { %1144 = vmatpush.msrb.mxu1 %v1088_v29 }
0x2306   :  { %940 = vrot.lane.b32.xlu2 %v932_v30, %s1468_s0  ;;  %v934_v32 = vadd.f32 %v932_v30, %v911_v31  ;;  %v1087_v30 = vld [vmem:[#allocation4 + $0xd0] sm:$0xff] }
0x2307   :  { %1145 = vmatpush.msrb.mxu1 %v1087_v30 }
0x2308   :  { %v935_v33 = vmul.f32 0.5, %v934_v32  ;;  %v1311_v32 = vld [vmem:[#allocation4 + $0xc0] ss:$0 sm:$0xff] }
0x230a   :  { %1364 = vtanh.f32 %v935_v33 }
0x2310   :  { %v1365_v34 = vpop.eup %1364 }
0x2311   :  { %v937_v35 = vmul.f32 0.5, %v1365_v34 }
0x2313   :  { %v938_v36 = vadd.f32 0.5, %v937_v35 }
0x2360   :  { %v941_v37 = vpop.permute.xlu2 %940 }
0x2361   :  { %v943_v38 = vmul.f32 %v941_v37, %v938_v36 }
0x2363   :  { %945 = vrot.lane.b32.xlu0 %v943_v38, %s1468_s0 }
0x23d5   :  { %v946_v39 = vpop.permute.xlu0 %945 }
0x23d6   :  { %v948_v12 = vadd.f32 %v946_v39, %v911_v31  ;;  %v1086_v31 = vld [vmem:[#allocation4 + $0xc8] sm:$0xff]  ;;  %v1471_v39 = vmov 0  }
0x23d7   :  { %1146 = vmatpush.msrb.mxu1 %v1086_v31  ;;  %1306 = vset.pattern.permute.xlu0 %v1471_v39 }
0x23d8   :  { %1366 = vtanh.f32 %v948_v12  ;;  %1305 = vset.pattern.permute.xlu2 %v1471_v39 }
0x23de   :  { %v1367_v40 = vpop.eup %1366 }
0x23df   :  { %v950_v41 = vsub.f32 %v904_v27, %v1367_v40 }
0x23e1   :  { %952 = vrot.lane.b32.xlu1 %v950_v41, %s1469_s22 }
0x2453   :  { %v953_v42 = vpop.permute.xlu1 %952 }
0x2454   :  { %v955_v43 = vmul.f32 %v953_v42, %v938_v36 }
0x2456   :  { %957 = vrot.lane.b32.xlu2 %v955_v43, %s1470_s23 }
0x24b0   :  { %v958_v44 = vpop.permute.xlu2 %957 }
0x24b1   :  { %v960_v45 = vadd.f32 %v1367_v40, %v958_v44 }
0x24b3   :  { %962 = vrot.lane.b32.xlu0 %v960_v45, %s1468_s0 }
0x2525   :  { %v963_v46 = vpop.permute.xlu0 %962 }
0x2526   :  { %965 = vst.msk [vmem:[#allocation3 + $0xa] sm:$0x3] %vm169_vm14, %v963_v46  ;;  %1287 = vmatmul.msk.f32.vlgmr.msrb.gmra.mxu2 %vm44_vm0, %v963_v46 }
0x2527   :  { %966 = vst.msk [vmem:[#allocation3 + $0x4] sm:$0x3] %vm95_vm5, %v963_v46 }
0x25a9   :  { %v987_v9 = vpop.f32.mrf.mxu2 }
0x25aa   :  { %v988_v47 = vadd.f32 %v1604_v50, %v987_v9 }
0x25ac   :  { %996 = vrot.lane.b32.xlu1 %v988_v47, %s1468_s0  ;;  %v990_v49 = vadd.f32 %v988_v47, %v967_v48 }
0x25ae   :  { %v991_v51 = vmul.f32 0.5, %v990_v49 }
0x25b0   :  { %1368 = vtanh.f32 %v991_v51 }
0x25b6   :  { %v1369_v52 = vpop.eup %1368 }
0x25b7   :  { %v993_v53 = vmul.f32 0.5, %v1369_v52 }
0x25b9   :  { %v994_v54 = vadd.f32 0.5, %v993_v53 }
0x261e   :  { %v997_v55 = vpop.permute.xlu1 %996 }
0x261f   :  { %v999_v56 = vmul.f32 %v997_v55, %v994_v54 }
0x2621   :  { %1001 = vrot.lane.b32.xlu2 %v999_v56, %s1468_s0  ;;  %v1092_v56 = vld [vmem:[#allocation4 + $0xf8] sm:$0xff] }
0x267b   :  { %v1002_v57 = vpop.permute.xlu2 %1001 }
0x267c   :  { %v1004_v58 = vadd.f32 %v1002_v57, %v967_v48 }
0x267e   :  { %1370 = vtanh.f32 %v1004_v58 }
0x2684   :  { %v1371_v59 = vpop.eup %1370 }
0x2685   :  { %v1006_v60 = vsub.f32 %v960_v45, %v1371_v59 }
0x2687   :  { %1008 = vrot.lane.b32.xlu0 %v1006_v60, %s1469_s22  ;;  %v1091_v60 = vld [vmem:[#allocation4 + $0xf0] sm:$0xff] }
0x26f9   :  { %v1009_v61 = vpop.permute.xlu0 %1008 }
0x26fa   :  { %v1011_v62 = vmul.f32 %v1009_v61, %v994_v54 }
0x26fc   :  { %1013 = vrot.lane.b32.xlu1 %v1011_v62, %s1470_s23 }
0x276e   :  { %v1014_v63 = vpop.permute.xlu1 %1013 }
0x276f   :  { %v1016_v0 = vadd.f32 %v1371_v59, %v1014_v63 }
0x2771   :  { %1018 = vrot.lane.b32.xlu2 %v1016_v0, %s1468_s0 }
0x27cb   :  { %v1019_v1 = vpop.permute.xlu2 %1018 }
0x27cc   :  { %1021 = vst.msk [vmem:[#allocation3 + $0xc] sm:$0x3] %vm169_vm14, %v1019_v1  ;;  %1288 = vmatmul.msk.f32.vlgmr.msra.gmra.mxu3 %vm44_vm0, %v1019_v1 }
0x27cd   :  { %1022 = vst.msk [vmem:[#allocation3 + $0x2] sm:$0x3] %vm95_vm5, %v1019_v1 }
0x284f   :  { %v1043_v2 = vpop.f32.mrf.mxu3 }
0x2850   :  { %v1044_v3 = vadd.f32 %v1604_v50, %v1043_v2 }
0x2852   :  { %1052 = vrot.lane.b32.xlu0 %v1044_v3, %s1468_s0  ;;  %v1046_v5 = vadd.f32 %v1044_v3, %v1023_v4 }
0x2854   :  { %v1047_v6 = vmul.f32 0.5, %v1046_v5 }
0x2856   :  { %1372 = vtanh.f32 %v1047_v6 }
0x285c   :  { %v1373_v7 = vpop.eup %1372 }
0x285d   :  { %v1049_v8 = vmul.f32 0.5, %v1373_v7 }
0x285f   :  { %v1050_v10 = vadd.f32 0.5, %v1049_v8 }
0x28c4   :  { %v1053_v11 = vpop.permute.xlu0 %1052 }
0x28c5   :  { %v1055_v13 = vmul.f32 %v1053_v11, %v1050_v10 }
0x28c7   :  { %1057 = vrot.lane.b32.xlu1 %v1055_v13, %s1468_s0 }
0x2939   :  { %v1058_v14 = vpop.permute.xlu1 %1057 }
0x293a   :  { %v1060_v15 = vadd.f32 %v1058_v14, %v1023_v4 }
0x293c   :  { %1374 = vtanh.f32 %v1060_v15 }
0x2942   :  { %v1375_v16 = vpop.eup %1374 }
0x2943   :  { %v1062_v17 = vsub.f32 %v1016_v0, %v1375_v16  ;;  %v1090_v0 = vld [vmem:[#allocation4 + $0xe8] sm:$0x3] }
0x2945   :  { %1064 = vrot.lane.b32.xlu2 %v1062_v17, %s1469_s22 }
0x299f   :  { %v1065_v50 = vpop.permute.xlu2 %1064 }
0x29a0   :  { %v1067_v18 = vmul.f32 %v1065_v50, %v1050_v10 }
0x29a2   :  { %1069 = vrot.lane.b32.xlu0 %v1067_v18, %s1470_s23 }
0x2a14   :  { %v1070_v19 = vpop.permute.xlu0 %1069 }
0x2a15   :  { %v1072_v20 = vadd.f32 %v1375_v16, %v1070_v19 }
0x2a17   :  { %1074 = vrot.lane.b32.xlu1 %v1072_v20, %s1468_s0 }
0x2a89   :  { %v1075_v25 = vpop.permute.xlu1 %1074 }
0x2a8a   :  { %1077 = vst.msk [vmem:[#allocation3 + $0xe] sm:$0x3] %vm169_vm14, %v1075_v25 }
0x2a8b   :  { %1078 = vst.msk [vmem:[#allocation3] sm:$0x3] %vm95_vm5, %v1075_v25 }
0x2a91   :  { %v1080_v27 = vld [vmem:[#allocation3 + $0x8] sm:$0xff] }
0x2a92   :  { %v1079_v26 = vld [vmem:[#allocation3] sm:$0xff] }
0x2a93   :  { %1289 = vmatmul.msk.f32.vlgmr.msra.gmra.mxu0 %vm44_vm0, %v1079_v26 }
0x2a9b   :  { %1290 = vmatmul.msk.f32.gmra.mxu0 %vm44_vm0, %v1080_v27 }
0x2b10   :  { %v1117_v33 = vpop.f32.mrf.mxu0 }
0x2b11   :  { %v1118_v34 = vadd.f32 %v1311_v32, %v1117_v33 }
0x2b13   :  { %1376 = vtanh.f32 %v1118_v34 }
0x2b18   :  { %v1120_v35 = vpop.f32.mrf.mxu0 }
0x2b19   :  { %v1377_v36 = vpop.eup %1376  ;;  %v1121_v37 = vadd.f32 %v1311_v32, %v1120_v35 }
0x2b1a   :  { %1291 = vmatmul.msk.f32.vlgmr.msrb.gmra.mxu1 %vm44_vm0, %v1377_v36 }
0x2b1b   :  { %1378 = vtanh.f32 %v1121_v37 }
0x2b21   :  { %v1379_v38 = vpop.eup %1378 }
0x2b22   :  { %1292 = vmatmul.msk.f32.gmra.mxu1 %vm44_vm0, %v1379_v38  ;;  %vm1182_vm0 = vcmask 130048  }
0x2b97   :  { %v1148_v12 = vpop.f32.mrf.mxu1 }
0x2b98   :  { %v1155_v41 = vsel %vm1154_vm15, %v1148_v12, -inf }
0x2b9f   :  { %v1151_v40 = vpop.f32.mrf.mxu1 }
0x2ba0   :  { %v1156_v42 = vsel %vm1154_vm15, %v1151_v40, -inf }
0x2ba1   :  { %v1157_v43 = vmax.f32 %v1155_v41, %v1156_v42 }
0x2ba3   :  { %v1158_v44 = vrot.slane %v1157_v43, 4 }
0x2ba5   :  { %v1159_v45 = vmax.f32 %v1157_v43, %v1158_v44 }
0x2ba7   :  { %v1160_v46 = vrot.slane %v1159_v45, 2 }
0x2ba9   :  { %v1161_v9 = vmax.f32 %v1159_v45, %v1160_v46 }
0x2bab   :  { %v1162_v47 = vrot.slane %v1161_v9, 1 }
0x2bad   :  { %v1163_v48 = vmax.f32 %v1161_v9, %v1162_v47 }
0x2baf   :  { %v1164_v49 = vsub.f32 %v1148_v12, %v1163_v48  ;;  %v1165_v51 = vsub.f32 %v1151_v40, %v1163_v48 }
0x2bb1   :  { %v1166_v52 = vmul.f32 1.442695, %v1164_v49  ;;  %v1168_v53 = vmul.f32 1.442695, %v1165_v51 }
0x2bb3   :  { %1380 = vpow2.f32 %v1166_v52 }
0x2bb4   :  { %1382 = vpow2.f32 %v1168_v53 }
0x2bb9   :  { %v1381_v54 = vpop.eup %1380 }
0x2bba   :  { %v1383_v55 = vpop.eup %1382  ;;  %1172 = vperm.xlu0 %1306, %v1381_v54  }
0x2bbb   :  { %1177 = vperm.xlu2 %1305, %v1383_v55  }
0x2c15   :  { %v1178_v57 = vpop.permute.xlu2 %1177 }
0x2c16   :  { %v1181_v58 = vmul.f32 %v1178_v57, %v1092_v56  ;;  %v1214_v59 = vmul.f32 %v1178_v57, %v1080_v27 }
0x2c18   :  { %1200 = vmatpush.msra.mxu2 %v1181_v58  ;;  %1229 = vmatpush.msrb.mxu3 %v1214_v59 }
0x2c2c   :  { %v1173_v61 = vpop.permute.xlu0 %1172 }
0x2c2d   :  { %v1180_v62 = vmul.f32 %v1173_v61, %v1091_v60  ;;  %v1213_v63 = vmul.f32 %v1173_v61, %v1079_v26 }
0x2c2f   :  { %1201 = vmatpush.msra.mxu2 %v1180_v62  ;;  %1230 = vmatpush.msrb.mxu3 %v1213_v63 }
0x2c30   :  { %1293 = vmatmul.msk.f32.vlgmr.msra.gmra.mxu2 %vm1182_vm0, %v1090_v0  ;;  %1294 = vmatmul.msk.f32.vlgmr.msrb.gmra.mxu3 %vm1182_vm0, %v1090_v0 }
0x2cb3   :  { %v1203_v1 = vpop.f32.mrf.mxu2  ;;  %v1232_v4 = vpop.f32.mrf.mxu3 }
0x2cb4   :  { %v1207_v2 = vsel %vm1206_vm1, %v1203_v1, 0.0 }
0x2cb5   :  { %1208 = vadd.xlane.f32.xlu1 %v1207_v2 }
0x2d28   :  { %v1209_v3 = vpop.xlane.xlu1 %1208 }
0x2d29   :  { %1384 = vrcp.f32 %v1209_v3 }
0x2d2f   :  { %v1385_v5 = vpop.eup %1384 }
0x2d30   :  { %v1211_v6 = vmul.f32 %v1385_v5, %v1203_v1  ;;  %v1235_v7 = vmul.f32 %v1385_v5, %v1232_v4 }
0x2d32   :  { %1212 = vst.msk [vmem:[#allocation7] sm:$0x3] %vm1206_vm1, %v1211_v6 }
0x2d33   :  { %1248 = dma.vmem_to_hbm [thread:$0]  %s1244_s25, 32, %s1246_s28, [#allocation6]   ;;  %1237 = vst.msk [vmem:[#allocation8] sm:$0x3] %vm1236_vm2, %v1235_v7 }
0x2d34   :  { %1259 = dma.vmem_to_hbm [thread:$0]  %s1255_s30, 32, %s1257_s6, [#allocation9]  }
0x2d35   :  { %1460 = dma.done.wait [#allocation6], 32  }
0x2d36   :  { %1461 = vsyncadd [#allocation6], 4294967264 }
0x2d37   :  { %1462 = dma.done.wait [#allocation9], 32  }
0x2d38   :  { %1463 = vsyncadd [#allocation9], 4294967264 }
0x2d39   :  { %1268 = vsyncpa [#allocation5], 1 }
0x2d3a   :  { %1269 = vsyncpa [#allocation6], 1 }
0x2d3b   :  { %1270 = vsyncpa [#allocation9], 1 }

</bundles_post_ra>
